<compile_context>
chip_gen: v7x
topology: tpu7x:2x2x1
jax: 0.10.0
libtpu: 0.0.40
codegen_flags: <defaults>
</compile_context>

<pallas_src>
import functools

import jax
import jax.numpy as jnp
import numpy as np
from jax.experimental import pallas as pl
from jax.experimental.pallas import tpu as pltpu


def _channel_attn_kernel(wc_ref, ctx_ref, wqc_ref, wcq_ref,
                         attn_ref, out_ref, t_scr, a_scr):
    """Fused ChannelAttention for a block of Bt batch elements.

    wc_ref  : (Bt*idf, Q)   weightedContext rows, lane-dense over Q = ih*iw (bf16)
    ctx_ref : (Bt, cdf, S)  context block (tiny)
    wqc_ref : (Q, cdf)      conv_context weight, (out_ch, in_ch) layout  -> VMEM resident
    wcq_ref : (cdf, Q)      conv_context weight transposed (lane-dense)  -> VMEM resident
    attn_ref: (Bt, idf, S)  softmax attention (transposed to (B, S, idf) in the wrapper)
    out_ref : (Bt*idf, Q)   weightedContext_c rows, already in (idf, ih*iw) layout
    t_scr   : (Bt*idf, cdf) f32 scratch:  t = wc @ W
    a_scr   : (Bt*idf, cdf) scratch    :  a = attn @ ctx^T   (weight dtype for bf16 MXU)
    """
    bt = ctx_ref.shape[0]
    idf = wc_ref.shape[0] // bt

    # ---- Q-sized matmul #1 (shared resident weight, M = Bt*idf): t = wc @ W -------
    t_scr[...] = jnp.dot(wc_ref[...], wqc_ref[...],
                         preferred_element_type=jnp.float32)            # (Bt*idf, cdf)

    # ---- tiny per-batch attention (idf x S each); static unrolled loop ------------
    for b in range(bt):
        rows = pl.ds(b * idf, idf)
        t_b = t_scr[rows, :]                                            # (idf, cdf) f32
        ctx_b = ctx_ref[b].astype(jnp.float32)                          # (cdf, S)

        # logits[i, s] = sum_c t[i, c] * ctx[c, s]   ( == wc @ sourceC, re-associated)
        logits = jnp.dot(t_b, ctx_b, preferred_element_type=jnp.float32)   # (idf, S)

        # Row softmax over sourceL (nn.Softmax() on the (B*idf, S) view -> dim=1).
        m = jnp.max(logits, axis=-1, keepdims=True)
        e = jnp.exp(logits - m)
        attn = e / jnp.sum(e, axis=-1, keepdims=True)                   # exact division
        attn_ref[b] = attn.astype(attn_ref.dtype)

        # a[i, c] = sum_s attn[i, s] * ctx[c, s]
        a_b = jax.lax.dot_general(attn, ctx_b, (((1,), (1,)), ((), ())),
                                  preferred_element_type=jnp.float32)   # (idf, cdf)
        a_scr[rows, :] = a_b.astype(a_scr.dtype)

    # ---- Q-sized matmul #2 (shared resident weight, lane-dense stores): out = a @ W^T
    out_ref[...] = jnp.dot(a_scr[...], wcq_ref[...],
                           preferred_element_type=jnp.float32).astype(out_ref.dtype)


def _pick_block_batch(batch, idf, q, itemsize):
    """Batch elements per grid step: largest divisor of `batch` whose streamed
    (Bt*idf, Q) slab is <= ~1 MiB (perf review: 0.5-2 MiB sweet spot).  Prefer >= 2
    grid steps (v7x has 2 TensorCores) when that keeps Bt*idf at a full 8-row tile."""
    cap = max(1, (1 << 20) // max(1, idf * q * itemsize))
    divisors = [d for d in range(1, batch + 1) if batch % d == 0]
    fits = [d for d in divisors if d <= cap]
    bt = max(fits) if fits else 1
    two_step = [d for d in fits if d <= batch // 2 and d * idf >= 8]
    if bt == batch and two_step:
        bt = max(two_step)
    return bt


@functools.partial(jax.jit, static_argnums=(2, 3))
def channel_attention_forward(weighted_context, context, ih, iw, w_qc, w_cq):
    """weighted_context: (B, idf, ih*iw); context: (B, cdf, S);
    w_qc: (ih*iw, cdf) = conv_context{2,3}.weight.squeeze() (PyTorch layout, bias=False);
    w_cq: (cdf, ih*iw) = the same weight pre-transposed once at init.
    Returns (weightedContext_c (B, idf, ih, iw), attn_c (B, S, idf)) like the PyTorch module."""
    B, idf, Q = weighted_context.shape
    cdf, S = context.shape[1], context.shape[2]
    assert Q == ih * iw
    assert w_qc.shape == (Q, cdf) and w_cq.shape == (cdf, Q)

    bt = _pick_block_batch(B, idf, Q, weighted_context.dtype.itemsize)
    grid = (B // bt,)

    wc2d = weighted_context.reshape(B * idf, Q)        # free reshape (merge leading dims)

    attn, out2d = pl.pallas_call(
        _channel_attn_kernel,
        grid=grid,
        in_specs=[
            pl.BlockSpec((bt * idf, Q), lambda g: (g, 0)),
            pl.BlockSpec((bt, cdf, S), lambda g: (g, 0, 0)),
            pl.BlockSpec((Q, cdf), lambda g: (0, 0)),   # constant index -> stays VMEM resident
            pl.BlockSpec((cdf, Q), lambda g: (0, 0)),   # constant index -> stays VMEM resident
        ],
        out_specs=(
            pl.BlockSpec((bt, idf, S), lambda g: (g, 0, 0)),
            pl.BlockSpec((bt * idf, Q), lambda g: (g, 0)),
        ),
        out_shape=(
            jax.ShapeDtypeStruct((B, idf, S), jnp.float32),
            jax.ShapeDtypeStruct((B * idf, Q), weighted_context.dtype),
        ),
        scratch_shapes=[
            pltpu.VMEM((bt * idf, cdf), jnp.float32),
            pltpu.VMEM((bt * idf, cdf), w_cq.dtype),
        ],
        compiler_params=pltpu.CompilerParams(dimension_semantics=("parallel",)),
    )(wc2d, context, w_qc, w_cq)

    weighted_context_c = out2d.reshape(B, idf, ih, iw)   # free reshape
    attn_c = jnp.transpose(attn, (0, 2, 1))              # (B, S, idf), matches PyTorch return
    return weighted_context_c, attn_c


def channel_attention_ref(weighted_context, context, w_qc, ih, iw):
    """Precision-independent float64 NumPy reference of the PyTorch forward, computed
    from the exact (possibly bf16-quantized) values fed to the kernel."""
    wc = np.asarray(jnp.asarray(weighted_context, jnp.float32), np.float64)
    ctx = np.asarray(jnp.asarray(context, jnp.float32), np.float64)
    w = np.asarray(jnp.asarray(w_qc, jnp.float32), np.float64)
    B, idf, _ = wc.shape
    sourceC = np.einsum('qc,bcs->bqs', w, ctx)                    # (B, Q, S)
    logits = np.einsum('biq,bqs->bis', wc, sourceC)               # (B, idf, S)
    e = np.exp(logits - logits.max(-1, keepdims=True))
    attn = e / e.sum(-1, keepdims=True)
    attn_t = np.transpose(attn, (0, 2, 1))                        # (B, S, idf)
    wcc = np.einsum('bqs,bsi->bqi', sourceC, attn_t)              # (B, Q, idf)
    wcc = np.transpose(wcc, (0, 2, 1)).reshape(B, idf, ih, iw)
    return wcc, attn_t


if __name__ == "__main__":
    # conv_context2 has 64*64 output channels, so the module requires queryL = ih*iw = 4096.
    # The ih == 128 branch (conv_context3) uses this same kernel with a (128*128, cdf) weight;
    # only the ih == 64 path is exercised in this script.
    B, idf, cdf, S = 2, 4, 8, 8
    ih = iw = 64
    Q = ih * iw

    key = jax.random.PRNGKey(0)
    k1, k2, k3 = jax.random.split(key, 3)
    # Streamed tensors in bf16 (kernel is HBM-bound after batch blocking); f32 accumulation in-kernel.
    weighted_context = (0.2 * jax.random.normal(k1, (B, idf, Q), jnp.float32)).astype(jnp.bfloat16)
    context = jax.random.normal(k2, (B, cdf, S), jnp.float32)
    # conv_context2.weight.squeeze(): (out_ch=Q, in_ch=cdf), bias=False.  Both layouts are
    # prepared once at init (no per-call transpose inside the jitted wrapper).
    w_f32 = 0.05 * jax.random.normal(k3, (Q, cdf), jnp.float32)
    w_qc = w_f32.astype(jnp.bfloat16)                      # (Q, cdf)
    w_cq = jnp.transpose(w_f32, (1, 0)).astype(jnp.bfloat16)   # (cdf, Q), lane-dense

    wcc, attn_c = channel_attention_forward(weighted_context, context, ih, iw, w_qc, w_cq)
    jax.block_until_ready((wcc, attn_c))

    assert wcc.shape == (B, idf, ih, iw), wcc.shape
    assert attn_c.shape == (B, S, idf), attn_c.shape
    assert bool(jnp.all(jnp.isfinite(wcc.astype(jnp.float32))))
    assert bool(jnp.all(jnp.isfinite(attn_c)))

    ref_wcc, ref_attn = channel_attention_ref(weighted_context, context, w_qc, ih, iw)
    np.testing.assert_allclose(np.asarray(attn_c, np.float64), ref_attn, rtol=2e-2, atol=2e-2)
    np.testing.assert_allclose(np.asarray(jnp.asarray(wcc, jnp.float32), np.float64),
                               ref_wcc, rtol=2e-2, atol=2e-2)
    print("KERNEL_OK")
</pallas_src>

<mosaic_0001>
module attributes {stable_mosaic.version = 11 : i64} {
  func.func @_channel_attn_kernel(%arg0: i32, %arg1: memref<8x4096xbf16, #tpu.memory_space<vmem>>, %arg2: memref<2x8x8xf32, #tpu.memory_space<vmem>>, %arg3: memref<4096x8xbf16, #tpu.memory_space<vmem>>, %arg4: memref<8x4096xbf16, #tpu.memory_space<vmem>>, %arg5: memref<2x4x8xf32, #tpu.memory_space<vmem>>, %arg6: memref<8x4096xbf16, #tpu.memory_space<vmem>>, %arg7: memref<8x8xf32, #tpu.memory_space<vmem>>, %arg8: memref<8x8xbf16, #tpu.memory_space<vmem>>) attributes {dimension_semantics = [#tpu.dimension_semantics<parallel>], iteration_bounds = array<i64: 1>, scalar_prefetch = 0 : i64, scratch_operands = 2 : i64, tpu.core_type = #tpu.core_type<tc>, window_params = [{transform_indices = @transform_0, window_bounds = array<i64: 8, 4096>}, {transform_indices = @transform_1, window_bounds = array<i64: 2, 8, 8>}, {pipeline_mode = #tpu.pipeline_mode<synchronous>, transform_indices = @transform_2, window_bounds = array<i64: 4096, 8>}, {pipeline_mode = #tpu.pipeline_mode<synchronous>, transform_indices = @transform_3, window_bounds = array<i64: 8, 4096>}, {transform_indices = @transform_4, window_bounds = array<i64: 2, 4, 8>}, {transform_indices = @transform_5, window_bounds = array<i64: 8, 4096>}]} {
    %c0 = arith.constant 0 : index
    %c0_0 = arith.constant 0 : index
    %0 = vector.load %arg1[%c0, %c0_0] : memref<8x4096xbf16, #tpu.memory_space<vmem>>, vector<8x4096xbf16>
    %c0_1 = arith.constant 0 : index
    %c0_2 = arith.constant 0 : index
    %1 = vector.load %arg3[%c0_1, %c0_2] : memref<4096x8xbf16, #tpu.memory_space<vmem>>, vector<4096x8xbf16>
    %cst = arith.constant dense<0.000000e+00> : vector<8x8xf32>
    %2 = tpu.matmul %0, %1, %cst {dimension_numbers = #tpu.dot_dimension_numbers<[1], [0], [0], [1], [0, 0, 1, 1], [], []>} : vector<8x4096xbf16>, vector<4096x8xbf16>, vector<8x8xf32> -> vector<8x8xf32>
    %c0_3 = arith.constant 0 : index
    %c0_4 = arith.constant 0 : index
    %3 = vector.load %arg7[%c0_3, %c0_4] : memref<8x8xf32, #tpu.memory_space<vmem>>, vector<8x8xf32>
    tpu.vector_store %arg7[%c0_3, %c0_4], %2 {strides = array<i32>} : memref<8x8xf32, #tpu.memory_space<vmem>>, vector<8x8xf32>,
    %c0_5 = arith.constant 0 : index
    %c0_6 = arith.constant 0 : index
    %4 = vector.load %arg7[%c0_5, %c0_6] : memref<8x8xf32, #tpu.memory_space<vmem>>, vector<4x8xf32>
    %c0_7 = arith.constant 0 : index
    %c0_8 = arith.constant 0 : index
    %c0_9 = arith.constant 0 : index
    %5 = vector.load %arg2[%c0_7, %c0_8, %c0_9] : memref<2x8x8xf32, #tpu.memory_space<vmem>>, vector<1x8x8xf32>
    %6 = vector.shape_cast %5 : vector<1x8x8xf32> to vector<8x8xf32>
    %cst_10 = arith.constant dense<0.000000e+00> : vector<4x8xf32>
    %7 = tpu.matmul %4, %6, %cst_10 {dimension_numbers = #tpu.dot_dimension_numbers<[1], [0], [0], [1], [0, 0, 1, 1], [], []>} : vector<4x8xf32>, vector<8x8xf32>, vector<4x8xf32> -> vector<4x8xf32>
    %cst_11 = arith.constant dense<0xFF800000> : vector<4xf32>
    %8 = vector.multi_reduction <maximumf>, %7, %cst_11 [1] : vector<4x8xf32> to vector<4xf32>
    %9 = vector.shape_cast %8 : vector<4xf32> to vector<4x1xf32>
    %10 = vector.broadcast %9 : vector<4x1xf32> to vector<4x8xf32>
    %11 = arith.subf %7, %10 : vector<4x8xf32>
    %12 = math.exp %11 : vector<4x8xf32>
    %cst_12 = arith.constant dense<0.000000e+00> : vector<4xf32>
    %13 = vector.multi_reduction <add>, %12, %cst_12 [1] : vector<4x8xf32> to vector<4xf32>
    %14 = vector.shape_cast %13 : vector<4xf32> to vector<4x1xf32>
    %15 = vector.broadcast %14 : vector<4x1xf32> to vector<4x8xf32>
    %16 = arith.divf %12, %15 : vector<4x8xf32>
    %c0_13 = arith.constant 0 : index
    %c0_14 = arith.constant 0 : index
    %c0_15 = arith.constant 0 : index
    %17 = vector.load %arg5[%c0_13, %c0_14, %c0_15] : memref<2x4x8xf32, #tpu.memory_space<vmem>>, vector<1x4x8xf32>
    %18 = vector.shape_cast %17 : vector<1x4x8xf32> to vector<4x8xf32>
    %19 = vector.shape_cast %16 : vector<4x8xf32> to vector<1x4x8xf32>
    tpu.vector_store %arg5[%c0_13, %c0_14, %c0_15], %19 {strides = array<i32>} : memref<2x4x8xf32, #tpu.memory_space<vmem>>, vector<1x4x8xf32>,
    %cst_16 = arith.constant dense<0.000000e+00> : vector<4x8xf32>
    %20 = tpu.matmul %16, %6, %cst_16 {dimension_numbers = #tpu.dot_dimension_numbers<[1], [1], [0], [0], [0, 0, 1, 0], [], []>} : vector<4x8xf32>, vector<8x8xf32>, vector<4x8xf32> -> vector<4x8xf32>
    %21 = arith.truncf %20 : vector<4x8xf32> to vector<4x8xbf16>
    %c0_17 = arith.constant 0 : index
    %c0_18 = arith.constant 0 : index
    %22 = vector.load %arg8[%c0_17, %c0_18] : memref<8x8xbf16, #tpu.memory_space<vmem>>, vector<4x8xbf16>
    tpu.vector_store %arg8[%c0_17, %c0_18], %21 {strides = array<i32>} : memref<8x8xbf16, #tpu.memory_space<vmem>>, vector<4x8xbf16>,
    %c4 = arith.constant 4 : index
    %c0_19 = arith.constant 0 : index
    %23 = vector.load %arg7[%c4, %c0_19] : memref<8x8xf32, #tpu.memory_space<vmem>>, vector<4x8xf32>
    %c1 = arith.constant 1 : index
    %c0_20 = arith.constant 0 : index
    %c0_21 = arith.constant 0 : index
    %24 = vector.load %arg2[%c1, %c0_20, %c0_21] : memref<2x8x8xf32, #tpu.memory_space<vmem>>, vector<1x8x8xf32>
    %25 = vector.shape_cast %24 : vector<1x8x8xf32> to vector<8x8xf32>
    %cst_22 = arith.constant dense<0.000000e+00> : vector<4x8xf32>
    %26 = tpu.matmul %23, %25, %cst_22 {dimension_numbers = #tpu.dot_dimension_numbers<[1], [0], [0], [1], [0, 0, 1, 1], [], []>} : vector<4x8xf32>, vector<8x8xf32>, vector<4x8xf32> -> vector<4x8xf32>
    %cst_23 = arith.constant dense<0xFF800000> : vector<4xf32>
    %27 = vector.multi_reduction <maximumf>, %26, %cst_23 [1] : vector<4x8xf32> to vector<4xf32>
    %28 = vector.shape_cast %27 : vector<4xf32> to vector<4x1xf32>
    %29 = vector.broadcast %28 : vector<4x1xf32> to vector<4x8xf32>
    %30 = arith.subf %26, %29 : vector<4x8xf32>
    %31 = math.exp %30 : vector<4x8xf32>
    %cst_24 = arith.constant dense<0.000000e+00> : vector<4xf32>
    %32 = vector.multi_reduction <add>, %31, %cst_24 [1] : vector<4x8xf32> to vector<4xf32>
    %33 = vector.shape_cast %32 : vector<4xf32> to vector<4x1xf32>
    %34 = vector.broadcast %33 : vector<4x1xf32> to vector<4x8xf32>
    %35 = arith.divf %31, %34 : vector<4x8xf32>
    %c1_25 = arith.constant 1 : index
    %c0_26 = arith.constant 0 : index
    %c0_27 = arith.constant 0 : index
    %36 = vector.load %arg5[%c1_25, %c0_26, %c0_27] : memref<2x4x8xf32, #tpu.memory_space<vmem>>, vector<1x4x8xf32>
    %37 = vector.shape_cast %36 : vector<1x4x8xf32> to vector<4x8xf32>
    %38 = vector.shape_cast %35 : vector<4x8xf32> to vector<1x4x8xf32>
    tpu.vector_store %arg5[%c1_25, %c0_26, %c0_27], %38 {strides = array<i32>} : memref<2x4x8xf32, #tpu.memory_space<vmem>>, vector<1x4x8xf32>,
    %cst_28 = arith.constant dense<0.000000e+00> : vector<4x8xf32>
    %39 = tpu.matmul %35, %25, %cst_28 {dimension_numbers = #tpu.dot_dimension_numbers<[1], [1], [0], [0], [0, 0, 1, 0], [], []>} : vector<4x8xf32>, vector<8x8xf32>, vector<4x8xf32> -> vector<4x8xf32>
    %40 = arith.truncf %39 : vector<4x8xf32> to vector<4x8xbf16>
    %c4_29 = arith.constant 4 : index
    %c0_30 = arith.constant 0 : index
    %41 = vector.load %arg8[%c4_29, %c0_30] : memref<8x8xbf16, #tpu.memory_space<vmem>>, vector<4x8xbf16>
    tpu.vector_store %arg8[%c4_29, %c0_30], %40 {strides = array<i32>} : memref<8x8xbf16, #tpu.memory_space<vmem>>, vector<4x8xbf16>,
    %c0_31 = arith.constant 0 : index
    %c0_32 = arith.constant 0 : index
    %42 = vector.load %arg8[%c0_31, %c0_32] : memref<8x8xbf16, #tpu.memory_space<vmem>>, vector<8x8xbf16>
    %c0_33 = arith.constant 0 : index
    %c0_34 = arith.constant 0 : index
    %43 = vector.load %arg4[%c0_33, %c0_34] : memref<8x4096xbf16, #tpu.memory_space<vmem>>, vector<8x4096xbf16>
    %cst_35 = arith.constant dense<0.000000e+00> : vector<8x4096xf32>
    %44 = tpu.matmul %42, %43, %cst_35 {dimension_numbers = #tpu.dot_dimension_numbers<[1], [0], [0], [1], [0, 0, 1, 1], [], []>} : vector<8x8xbf16>, vector<8x4096xbf16>, vector<8x4096xf32> -> vector<8x4096xf32>
    %45 = arith.truncf %44 : vector<8x4096xf32> to vector<8x4096xbf16>
    %c0_36 = arith.constant 0 : index
    %c0_37 = arith.constant 0 : index
    %46 = vector.load %arg6[%c0_36, %c0_37] : memref<8x4096xbf16, #tpu.memory_space<vmem>>, vector<8x4096xbf16>
    tpu.vector_store %arg6[%c0_36, %c0_37], %45 {strides = array<i32>} : memref<8x4096xbf16, #tpu.memory_space<vmem>>, vector<8x4096xbf16>,
    return
  }
  func.func @transform_0(%arg0: i32) -> (i32, i32) {
    %c0_i32 = arith.constant 0 : i32
    %c0_i32_0 = arith.constant 0 : i32
    return %arg0, %c0_i32 : i32, i32
  }
  func.func @transform_1(%arg0: i32) -> (i32, i32, i32) {
    %c0_i32 = arith.constant 0 : i32
    %c0_i32_0 = arith.constant 0 : i32
    %c0_i32_1 = arith.constant 0 : i32
    return %arg0, %c0_i32, %c0_i32_0 : i32, i32, i32
  }
  func.func @transform_2(%arg0: i32) -> (i32, i32) {
    %c0_i32 = arith.constant 0 : i32
    %c0_i32_0 = arith.constant 0 : i32
    %c0_i32_1 = arith.constant 0 : i32
    return %c0_i32, %c0_i32_0 : i32, i32
  }
  func.func @transform_3(%arg0: i32) -> (i32, i32) {
    %c0_i32 = arith.constant 0 : i32
    %c0_i32_0 = arith.constant 0 : i32
    %c0_i32_1 = arith.constant 0 : i32
    return %c0_i32, %c0_i32_0 : i32, i32
  }
  func.func @transform_4(%arg0: i32) -> (i32, i32, i32) {
    %c0_i32 = arith.constant 0 : i32
    %c0_i32_0 = arith.constant 0 : i32
    %c0_i32_1 = arith.constant 0 : i32
    return %arg0, %c0_i32, %c0_i32_0 : i32, i32, i32
  }
  func.func @transform_5(%arg0: i32) -> (i32, i32) {
    %c0_i32 = arith.constant 0 : i32
    %c0_i32_0 = arith.constant 0 : i32
    return %arg0, %c0_i32 : i32, i32
  }
}

</mosaic_0001>

<bundles_post_ra>
// kernel: channel_attention_forward.1
= control target key start
LH: loop header
LB: loop body
LE: loop exit
PB: predicated region body
PF: predicated region fallthrough
CT: control target
= control target key end

     0   :  { %s6400_s0 = inlined_call_operand.vmem [shape: bf16[8,4096], index: 0, kind: input, shape index: {}]   ;;  %s6401_s1 = inlined_call_operand.vmem [shape: f32[2,8,8], index: 1, kind: input, shape index: {}]   ;;  %s6402_s2 = inlined_call_operand.vmem [shape: bf16[4096,8], index: 2, kind: input, shape index: {}]   ;;  %s6403_s3 = inlined_call_operand.vmem [shape: bf16[8,4096], index: 3, kind: input, shape index: {}]   ;;  %s6404_s4 = inlined_call_operand.hbm [shape: f32[2,4,8], index: 4, kind: output, shape index: {0}]   ;;  %s6405_s5 = inlined_call_operand.vmem [shape: bf16[8,4096], index: 5, kind: output, shape index: {1}]  }
   0x1   :  { %v4975_v0 = vld [vmem:[%s6402_s2 + $0x40] sm:$0xff]   ;;  %v4979_v4 = vld [vmem:[%s6402_s2 + $0x48] sm:$0xff]   ;;  %v4983_v8 = vld [vmem:[%s6402_s2 + $0x50] sm:$0xff]  }
   0x2   :  { %v4976_v1 = vld [vmem:[%s6402_s2 + $0xc0] sm:$0xff]   ;;  %4589 = vmatprep.subr.bf16.mxu0 %v4975_v0  ;;  %v4980_v5 = vld [vmem:[%s6402_s2 + $0xc8] sm:$0xff]   ;;  %v4984_v9 = vld [vmem:[%s6402_s2 + $0xd0] sm:$0xff]  }
   0x3   :  { %v4977_v2 = vld [vmem:[%s6402_s2] sm:$0xff]   ;;  %4611 = vmatprep.subr.bf16.mxu1 %v4976_v1  ;;  %v4981_v6 = vld [vmem:[%s6402_s2 + $0x8] sm:$0xff]   ;;  %v4985_v10 = vld [vmem:[%s6402_s2 + $0x10] sm:$0xff]  }
   0x4   :  { %v4978_v3 = vld [vmem:[%s6402_s2 + $0x80] sm:$0xff]   ;;  %4590 = vmatpush3.bf16.msra.mxu0 %v4977_v2  ;;  %v4982_v7 = vld [vmem:[%s6402_s2 + $0x88] sm:$0xff]   ;;  %v4986_v11 = vld [vmem:[%s6402_s2 + $0x90] sm:$0xff]  }
   0x5   :  { %4612 = vmatpush3.bf16.msra.mxu1 %v4978_v3  ;;  %4591 = vmatprep.subr.bf16.mxu0 %v4979_v4  ;;  %v4987_v12 = vld [vmem:[%s6402_s2 + $0x58] sm:$0xff]   ;;  %v4991_v16 = vld [vmem:[%s6402_s2 + $0x60] sm:$0xff]   ;;  %v4995_v20 = vld [vmem:[%s6402_s2 + $0x68] sm:$0xff]  }
   0x6   :  { %4613 = vmatprep.subr.bf16.mxu1 %v4980_v5  ;;  %v4988_v13 = vld [vmem:[%s6402_s2 + $0xd8] sm:$0xff]   ;;  %v4992_v17 = vld [vmem:[%s6402_s2 + $0xe0] sm:$0xff]   ;;  %v4996_v21 = vld [vmem:[%s6402_s2 + $0xe8] sm:$0xff]  }
   0x7   :  { %v4989_v14 = vld [vmem:[%s6402_s2 + $0x18] sm:$0xff]   ;;  %v4993_v18 = vld [vmem:[%s6402_s2 + $0x20] sm:$0xff]   ;;  %v4997_v22 = vld [vmem:[%s6402_s2 + $0x28] sm:$0xff]  }
   0x8   :  { %4592 = vmatpush3.bf16.msra.mxu0 %v4981_v6  ;;  %v4990_v15 = vld [vmem:[%s6402_s2 + $0x98] sm:$0xff]   ;;  %v4994_v19 = vld [vmem:[%s6402_s2 + $0xa0] sm:$0xff]   ;;  %v4998_v23 = vld [vmem:[%s6402_s2 + $0xa8] sm:$0xff]  }
   0x9   :  { %4614 = vmatpush3.bf16.msra.mxu1 %v4982_v7  ;;  %4593 = vmatprep.subr.bf16.mxu0 %v4983_v8  ;;  %v4999_v24 = vld [vmem:[%s6402_s2 + $0x70] sm:$0xff]   ;;  %v5003_v28 = vld [vmem:[%s6402_s2 + $0x78] sm:$0xff]   ;;  %v21_v32 = vld [vmem:[%s6400_s0] sm:$0xff] }
   0xa   :  { %4615 = vmatprep.subr.bf16.mxu1 %v4984_v9  ;;  %v5000_v25 = vld [vmem:[%s6402_s2 + $0xf0] sm:$0xff]   ;;  %v5004_v29 = vld [vmem:[%s6402_s2 + $0xf8] sm:$0xff]   ;;  %v22_v33 = vld [vmem:[%s6400_s0 + $0x8] sm:$0xff]  ;;  %v4196_v34 = vcombine.low %v21_v32, %v21_v32  ;;  %v4197_v35 = vcombine.high %v21_v32, %v21_v32 }
   0xb   :  { %v5001_v26 = vld [vmem:[%s6402_s2 + $0x30] sm:$0xff]   ;;  %v5005_v30 = vld [vmem:[%s6402_s2 + $0x38] sm:$0xff]   ;;  %v4198_v36 = vcombine.low %v22_v33, %v22_v33  ;;  %v4199_v37 = vcombine.high %v22_v33, %v22_v33  ;;  %v5011_v38 = vld [vmem:[%s6402_s2 + $0x140] sm:$0xff]  }
   0xc   :  { %4594 = vmatpush3.bf16.msra.mxu0 %v4985_v10  ;;  %v5002_v27 = vld [vmem:[%s6402_s2 + $0xb0] sm:$0xff]   ;;  %v5006_v31 = vld [vmem:[%s6402_s2 + $0xb8] sm:$0xff]   ;;  %v5012_v39 = vld [vmem:[%s6402_s2 + $0x1c0] sm:$0xff]   ;;  %2229 = vmatprep.mubr.bf16.mxu0 %v4197_v35 }
   0xd   :  { %4616 = vmatpush3.bf16.msra.mxu1 %v4986_v11  ;;  %4595 = vmatprep.subr.bf16.mxu0 %v4987_v12  ;;  %v5013_v40 = vld [vmem:[%s6402_s2 + $0x100] sm:$0xff]   ;;  %v5015_v42 = vld [vmem:[%s6402_s2 + $0x148] sm:$0xff]   ;;  %v5019_v46 = vld [vmem:[%s6402_s2 + $0x150] sm:$0xff]  }
   0xe   :  { %4617 = vmatprep.subr.bf16.mxu1 %v4988_v13  ;;  %2269 = vmatprep.mubr.bf16.mxu1 %v4199_v37  ;;  %v5014_v41 = vld [vmem:[%s6402_s2 + $0x180] sm:$0xff]   ;;  %v5016_v43 = vld [vmem:[%s6402_s2 + $0x1c8] sm:$0xff]   ;;  %v5020_v47 = vld [vmem:[%s6402_s2 + $0x1d0] sm:$0xff]  }
   0xf   :  { %v5017_v44 = vld [vmem:[%s6402_s2 + $0x108] sm:$0xff]   ;;  %v5021_v48 = vld [vmem:[%s6402_s2 + $0x110] sm:$0xff]   ;;  %v5023_v50 = vld [vmem:[%s6402_s2 + $0x158] sm:$0xff]  }
  0x10   :  { %4596 = vmatpush3.bf16.msra.mxu0 %v4989_v14  ;;  %v5018_v45 = vld [vmem:[%s6402_s2 + $0x188] sm:$0xff]   ;;  %v5022_v49 = vld [vmem:[%s6402_s2 + $0x190] sm:$0xff]   ;;  %v5024_v51 = vld [vmem:[%s6402_s2 + $0x1d8] sm:$0xff]  }
  0x11   :  { %4618 = vmatpush3.bf16.msra.mxu1 %v4990_v15  ;;  %4597 = vmatprep.subr.bf16.mxu0 %v4991_v16  ;;  %v5025_v52 = vld [vmem:[%s6402_s2 + $0x118] sm:$0xff]   ;;  %v5027_v54 = vld [vmem:[%s6402_s2 + $0x160] sm:$0xff]   ;;  %v5031_v58 = vld [vmem:[%s6402_s2 + $0x168] sm:$0xff]  }
  0x12   :  { %4619 = vmatprep.subr.bf16.mxu1 %v4992_v17  ;;  %v5026_v53 = vld [vmem:[%s6402_s2 + $0x198] sm:$0xff]   ;;  %v5028_v55 = vld [vmem:[%s6402_s2 + $0x1e0] sm:$0xff]   ;;  %v5032_v59 = vld [vmem:[%s6402_s2 + $0x1e8] sm:$0xff]  }
  0x13   :  { %v5029_v56 = vld [vmem:[%s6402_s2 + $0x120] sm:$0xff]   ;;  %v5033_v60 = vld [vmem:[%s6402_s2 + $0x128] sm:$0xff]   ;;  %v5035_v62 = vld [vmem:[%s6402_s2 + $0x170] sm:$0xff]  }
  0x14   :  { %4598 = vmatpush3.bf16.msra.mxu0 %v4993_v18  ;;  %v5030_v57 = vld [vmem:[%s6402_s2 + $0x1a0] sm:$0xff]   ;;  %v5034_v61 = vld [vmem:[%s6402_s2 + $0x1a8] sm:$0xff]   ;;  %v5036_v63 = vld [vmem:[%s6402_s2 + $0x1f0] sm:$0xff]  }
  0x15   :  { %4620 = vmatpush3.bf16.msra.mxu1 %v4994_v19  ;;  %4599 = vmatprep.subr.bf16.mxu0 %v4995_v20  ;;  %v5037_v0 = vld [vmem:[%s6402_s2 + $0x130] sm:$0xff]   ;;  %v5039_v2 = vld [vmem:[%s6402_s2 + $0x178] sm:$0xff]   ;;  %v5047_v12 = vld [vmem:[%s6402_s2 + $0x240] sm:$0xff]  }
  0x16   :  { %4621 = vmatprep.subr.bf16.mxu1 %v4996_v21  ;;  %v5038_v1 = vld [vmem:[%s6402_s2 + $0x1b0] sm:$0xff]   ;;  %v5040_v3 = vld [vmem:[%s6402_s2 + $0x1f8] sm:$0xff]   ;;  %v5048_v13 = vld [vmem:[%s6402_s2 + $0x2c0] sm:$0xff]  }
  0x17   :  { %v5041_v4 = vld [vmem:[%s6402_s2 + $0x138] sm:$0xff]   ;;  %v23_v6 = vld [vmem:[%s6400_s0 + $0x10] sm:$0xff]  ;;  %v5049_v14 = vld [vmem:[%s6402_s2 + $0x200] sm:$0xff]  }
  0x18   :  { %4600 = vmatpush3.bf16.msra.mxu0 %v4997_v22  ;;  %v5042_v5 = vld [vmem:[%s6402_s2 + $0x1b8] sm:$0xff]   ;;  %v4200_v7 = vcombine.low %v23_v6, %v23_v6  ;;  %v4201_v8 = vcombine.high %v23_v6, %v23_v6  ;;  %v5050_v15 = vld [vmem:[%s6402_s2 + $0x280] sm:$0xff]   ;;  %v5051_v16 = vld [vmem:[%s6402_s2 + $0x248] sm:$0xff]  }
  0x19   :  { %4622 = vmatpush3.bf16.msra.mxu1 %v4998_v23  ;;  %4601 = vmatprep.subr.bf16.mxu0 %v4999_v24  ;;  %v24_v9 = vld [vmem:[%s6400_s0 + $0x18] sm:$0xff]  ;;  %v5052_v17 = vld [vmem:[%s6402_s2 + $0x2c8] sm:$0xff]   ;;  %v5055_v20 = vld [vmem:[%s6402_s2 + $0x250] sm:$0xff]  }
  0x1a   :  { %4623 = vmatprep.subr.bf16.mxu1 %v5000_v25  ;;  %v4202_v10 = vcombine.low %v24_v9, %v24_v9  ;;  %v4203_v11 = vcombine.high %v24_v9, %v24_v9  ;;  %v5053_v18 = vld [vmem:[%s6402_s2 + $0x208] sm:$0xff]   ;;  %v5056_v21 = vld [vmem:[%s6402_s2 + $0x2d0] sm:$0xff]   ;;  %v5059_v24 = vld [vmem:[%s6402_s2 + $0x258] sm:$0xff]  }
  0x1b   :  { %v5054_v19 = vld [vmem:[%s6402_s2 + $0x288] sm:$0xff]   ;;  %v5057_v22 = vld [vmem:[%s6402_s2 + $0x210] sm:$0xff]   ;;  %v5060_v25 = vld [vmem:[%s6402_s2 + $0x2d8] sm:$0xff]  }
  0x1c   :  { %4602 = vmatpush3.bf16.msra.mxu0 %v5001_v26  ;;  %v5058_v23 = vld [vmem:[%s6402_s2 + $0x290] sm:$0xff]   ;;  %v5061_v26 = vld [vmem:[%s6402_s2 + $0x218] sm:$0xff]   ;;  %v5067_v32 = vld [vmem:[%s6402_s2 + $0x268] sm:$0xff]  }
  0x1d   :  { %4624 = vmatpush3.bf16.msra.mxu1 %v5002_v27  ;;  %4603 = vmatprep.subr.bf16.mxu0 %v5003_v28  ;;  %v5062_v27 = vld [vmem:[%s6402_s2 + $0x298] sm:$0xff]   ;;  %v5063_v28 = vld [vmem:[%s6402_s2 + $0x260] sm:$0xff]   ;;  %v5068_v33 = vld [vmem:[%s6402_s2 + $0x2e8] sm:$0xff]  }
  0x1e   :  { %4625 = vmatprep.subr.bf16.mxu1 %v5004_v29  ;;  %v5064_v29 = vld [vmem:[%s6402_s2 + $0x2e0] sm:$0xff]   ;;  %v5070_v35 = vld [vmem:[%s6402_s2 + $0x2a8] sm:$0xff]   ;;  %v5072_v37 = vld [vmem:[%s6402_s2 + $0x2f0] sm:$0xff]  }
  0x1f   :  { %v5103_v6 = vld [vmem:[%s6402_s2 + $0x368] sm:$0xff]  }
  0x20   :  { %4604 = vmatpush3.bf16.msra.mxu0 %v5005_v30  ;;  %v5065_v30 = vld [vmem:[%s6402_s2 + $0x220] sm:$0xff]   ;;  %v5106_v9 = vld [vmem:[%s6402_s2 + $0x3a8] sm:$0xff]  }
  0x21   :  { %4626 = vmatpush3.bf16.msra.mxu1 %v5006_v31  ;;  %4633 = vmatprep.subr.bf16.mxu0 %v5011_v38  ;;  %v5066_v31 = vld [vmem:[%s6402_s2 + $0x2a0] sm:$0xff]   ;;  %v5073_v38 = vld [vmem:[%s6402_s2 + $0x230] sm:$0xff]  }
  0x22   :  { %4655 = vmatprep.subr.bf16.mxu1 %v5012_v39  ;;  %v5074_v39 = vld [vmem:[%s6402_s2 + $0x2b0] sm:$0xff]  }
  0x23   :  { %2230 = vmatmul.mubr.bf16.vlgmr.msra.gmra.mrb[0].mxu0 %v4196_v34  ;;  %v5069_v34 = vld [vmem:[%s6402_s2 + $0x228] sm:$0xff]  }
  0x24   :  { %2270 = vmatmul.mubr.bf16.vlgmr.msra.gmra.mrb[0].mxu1 %v4198_v36  ;;  %4634 = vmatpush3.bf16.msra.mxu0 %v5013_v40  ;;  %v5071_v36 = vld [vmem:[%s6402_s2 + $0x270] sm:$0xff]   ;;  %v5075_v40 = vld [vmem:[%s6402_s2 + $0x278] sm:$0xff]  }
  0x25   :  { %4656 = vmatpush3.bf16.msra.mxu1 %v5014_v41  ;;  %4635 = vmatprep.subr.bf16.mxu0 %v5015_v42  ;;  %v5076_v41 = vld [vmem:[%s6402_s2 + $0x2f8] sm:$0xff]  }
  0x26   :  { %4657 = vmatprep.subr.bf16.mxu1 %v5016_v43  ;;  %2309 = vmatprep.mubr.bf16.mxu0 %v4201_v8  ;;  %v5077_v42 = vld [vmem:[%s6402_s2 + $0x238] sm:$0xff]   ;;  %v5105_v8 = vld [vmem:[%s6402_s2 + $0x328] sm:$0xff]  }
  0x27   :  { %2349 = vmatprep.mubr.bf16.mxu1 %v4203_v11  ;;  %v5078_v43 = vld [vmem:[%s6402_s2 + $0x2b8] sm:$0xff]   ;;  %v5108_v11 = vld [vmem:[%s6402_s2 + $0x3f0] sm:$0xff]  }
  0x28   :  { %4636 = vmatpush3.bf16.msra.mxu0 %v5017_v44  ;;  %v25_v44 = vld [vmem:[%s6400_s0 + $0x20] sm:$0xff] }
  0x29   :  { %4658 = vmatpush3.bf16.msra.mxu1 %v5018_v45  ;;  %4637 = vmatprep.subr.bf16.mxu0 %v5019_v46  ;;  %v26_v45 = vld [vmem:[%s6400_s0 + $0x28] sm:$0xff]  ;;  %v4204_v46 = vcombine.low %v25_v44, %v25_v44 }
  0x2a   :  { %4659 = vmatprep.subr.bf16.mxu1 %v5020_v47  ;;  %v4205_v47 = vcombine.high %v25_v44, %v25_v44  ;;  %v5139_v44 = vld [vmem:[%s6402_s2 + $0x468] sm:$0xff]  }
  0x2c   :  { %4638 = vmatpush3.bf16.msra.mxu0 %v5021_v48  ;;  %v4206_v48 = vcombine.low %v26_v45, %v26_v45 }
  0x2d   :  { %4660 = vmatpush3.bf16.msra.mxu1 %v5022_v49  ;;  %4639 = vmatprep.subr.bf16.mxu0 %v5023_v50  ;;  %v4207_v49 = vcombine.high %v26_v45, %v26_v45  ;;  %v5083_v50 = vld [vmem:[%s6402_s2 + $0x340] sm:$0xff]   ;;  %v5140_v45 = vld [vmem:[%s6402_s2 + $0x4e8] sm:$0xff]  }
  0x2e   :  { %4661 = vmatprep.subr.bf16.mxu1 %v5024_v51  ;;  %v5084_v51 = vld [vmem:[%s6402_s2 + $0x3c0] sm:$0xff]  }
  0x30   :  { %4640 = vmatpush3.bf16.msra.mxu0 %v5025_v52  ;;  %v5085_v52 = vld [vmem:[%s6402_s2 + $0x300] sm:$0xff]  }
  0x31   :  { %4662 = vmatpush3.bf16.msra.mxu1 %v5026_v53  ;;  %4641 = vmatprep.subr.bf16.mxu0 %v5027_v54  ;;  %v5086_v53 = vld [vmem:[%s6402_s2 + $0x380] sm:$0xff]   ;;  %v5087_v54 = vld [vmem:[%s6402_s2 + $0x348] sm:$0xff]  }
  0x32   :  { %4663 = vmatprep.subr.bf16.mxu1 %v5028_v55  ;;  %v5088_v55 = vld [vmem:[%s6402_s2 + $0x3c8] sm:$0xff]  }
  0x34   :  { %4642 = vmatpush3.bf16.msra.mxu0 %v5029_v56  ;;  %v5089_v56 = vld [vmem:[%s6402_s2 + $0x308] sm:$0xff]  }
  0x35   :  { %4664 = vmatpush3.bf16.msra.mxu1 %v5030_v57  ;;  %4643 = vmatprep.subr.bf16.mxu0 %v5031_v58  ;;  %v5090_v57 = vld [vmem:[%s6402_s2 + $0x388] sm:$0xff]   ;;  %v5091_v58 = vld [vmem:[%s6402_s2 + $0x350] sm:$0xff]  }
  0x36   :  { %4665 = vmatprep.subr.bf16.mxu1 %v5032_v59  ;;  %v5092_v59 = vld [vmem:[%s6402_s2 + $0x3d0] sm:$0xff]  }
  0x38   :  { %4644 = vmatpush3.bf16.msra.mxu0 %v5033_v60  ;;  %v5093_v60 = vld [vmem:[%s6402_s2 + $0x310] sm:$0xff]  }
  0x39   :  { %4666 = vmatpush3.bf16.msra.mxu1 %v5034_v61  ;;  %4645 = vmatprep.subr.bf16.mxu0 %v5035_v62  ;;  %v5094_v61 = vld [vmem:[%s6402_s2 + $0x390] sm:$0xff]   ;;  %v5095_v62 = vld [vmem:[%s6402_s2 + $0x358] sm:$0xff]  }
  0x3a   :  { %4667 = vmatprep.subr.bf16.mxu1 %v5036_v63  ;;  %v5096_v63 = vld [vmem:[%s6402_s2 + $0x3d8] sm:$0xff]  }
  0x3c   :  { %4646 = vmatpush3.bf16.msra.mxu0 %v5037_v0  ;;  %v5097_v0 = vld [vmem:[%s6402_s2 + $0x318] sm:$0xff]  }
  0x3d   :  { %4668 = vmatpush3.bf16.msra.mxu1 %v5038_v1  ;;  %4647 = vmatprep.subr.bf16.mxu0 %v5039_v2  ;;  %v5098_v1 = vld [vmem:[%s6402_s2 + $0x398] sm:$0xff]   ;;  %v5099_v2 = vld [vmem:[%s6402_s2 + $0x360] sm:$0xff]  }
  0x3e   :  { %4669 = vmatprep.subr.bf16.mxu1 %v5040_v3  ;;  %v5100_v3 = vld [vmem:[%s6402_s2 + $0x3e0] sm:$0xff]  }
  0x40   :  { %4648 = vmatpush3.bf16.msra.mxu0 %v5041_v4  ;;  %v5101_v4 = vld [vmem:[%s6402_s2 + $0x320] sm:$0xff]  }
  0x41   :  { %4670 = vmatpush3.bf16.msra.mxu1 %v5042_v5  ;;  %4677 = vmatprep.subr.bf16.mxu0 %v5047_v12  ;;  %v5102_v5 = vld [vmem:[%s6402_s2 + $0x3a0] sm:$0xff]   ;;  %v5109_v12 = vld [vmem:[%s6402_s2 + $0x330] sm:$0xff]  }
  0x42   :  { %4699 = vmatprep.subr.bf16.mxu1 %v5048_v13  ;;  %v5110_v13 = vld [vmem:[%s6402_s2 + $0x3b0] sm:$0xff]  }
  0x43   :  { %2310 = vmatmul.mubr.bf16.vlgmr.msra.gmra.mrb[4].mxu0 %v4200_v7  ;;  %v5104_v7 = vld [vmem:[%s6402_s2 + $0x3e8] sm:$0xff]  }
  0x44   :  { %2350 = vmatmul.mubr.bf16.vlgmr.msra.gmra.mrb[4].mxu1 %v4202_v10  ;;  %4678 = vmatpush3.bf16.msra.mxu0 %v5049_v14  ;;  %v5107_v10 = vld [vmem:[%s6402_s2 + $0x370] sm:$0xff]   ;;  %v5111_v14 = vld [vmem:[%s6402_s2 + $0x378] sm:$0xff]  }
  0x45   :  { %4700 = vmatpush3.bf16.msra.mxu1 %v5050_v15  ;;  %4679 = vmatprep.subr.bf16.mxu0 %v5051_v16  ;;  %v5112_v15 = vld [vmem:[%s6402_s2 + $0x3f8] sm:$0xff]  }
  0x46   :  { %4701 = vmatprep.subr.bf16.mxu1 %v5052_v17  ;;  %2389 = vmatprep.mubr.bf16.mxu0 %v4205_v47  ;;  %v5113_v16 = vld [vmem:[%s6402_s2 + $0x338] sm:$0xff]   ;;  %v5142_v47 = vld [vmem:[%s6402_s2 + $0x4a8] sm:$0xff]  }
  0x47   :  { %2429 = vmatprep.mubr.bf16.mxu1 %v4207_v49  ;;  %v5114_v17 = vld [vmem:[%s6402_s2 + $0x3b8] sm:$0xff]   ;;  %v5144_v49 = vld [vmem:[%s6402_s2 + $0x4f0] sm:$0xff]  }
  0x48   :  { %4680 = vmatpush3.bf16.msra.mxu0 %v5053_v18  ;;  %v27_v18 = vld [vmem:[%s6400_s0 + $0x30] sm:$0xff] }
  0x49   :  { %4702 = vmatpush3.bf16.msra.mxu1 %v5054_v19  ;;  %4681 = vmatprep.subr.bf16.mxu0 %v5055_v20  ;;  %v28_v19 = vld [vmem:[%s6400_s0 + $0x38] sm:$0xff]  ;;  %v4208_v20 = vcombine.low %v27_v18, %v27_v18 }
  0x4a   :  { %4703 = vmatprep.subr.bf16.mxu1 %v5056_v21  ;;  %v4209_v21 = vcombine.high %v27_v18, %v27_v18  ;;  %v5175_v18 = vld [vmem:[%s6402_s2 + $0x568] sm:$0xff]  }
  0x4c   :  { %4682 = vmatpush3.bf16.msra.mxu0 %v5057_v22  ;;  %v4210_v22 = vcombine.low %v28_v19, %v28_v19 }
  0x4d   :  { %4704 = vmatpush3.bf16.msra.mxu1 %v5058_v23  ;;  %4683 = vmatprep.subr.bf16.mxu0 %v5059_v24  ;;  %v5119_v23 = vld [vmem:[%s6402_s2 + $0x440] sm:$0xff]   ;;  %v4211_v24 = vcombine.high %v28_v19, %v28_v19  ;;  %v5176_v19 = vld [vmem:[%s6402_s2 + $0x5e8] sm:$0xff]  }
  0x4e   :  { %4705 = vmatprep.subr.bf16.mxu1 %v5060_v25  ;;  %v5120_v25 = vld [vmem:[%s6402_s2 + $0x4c0] sm:$0xff]  }
  0x50   :  { %4684 = vmatpush3.bf16.msra.mxu0 %v5061_v26  ;;  %v5121_v26 = vld [vmem:[%s6402_s2 + $0x400] sm:$0xff]  }
  0x51   :  { %4706 = vmatpush3.bf16.msra.mxu1 %v5062_v27  ;;  %4685 = vmatprep.subr.bf16.mxu0 %v5063_v28  ;;  %v5122_v27 = vld [vmem:[%s6402_s2 + $0x480] sm:$0xff]   ;;  %v5123_v28 = vld [vmem:[%s6402_s2 + $0x448] sm:$0xff]  }
  0x52   :  { %4707 = vmatprep.subr.bf16.mxu1 %v5064_v29  ;;  %v5124_v29 = vld [vmem:[%s6402_s2 + $0x4c8] sm:$0xff]  }
  0x54   :  { %4686 = vmatpush3.bf16.msra.mxu0 %v5065_v30  ;;  %v5125_v30 = vld [vmem:[%s6402_s2 + $0x408] sm:$0xff]  }
  0x55   :  { %4708 = vmatpush3.bf16.msra.mxu1 %v5066_v31  ;;  %4687 = vmatprep.subr.bf16.mxu0 %v5067_v32  ;;  %v5126_v31 = vld [vmem:[%s6402_s2 + $0x488] sm:$0xff]   ;;  %v5127_v32 = vld [vmem:[%s6402_s2 + $0x450] sm:$0xff]  }
  0x56   :  { %4709 = vmatprep.subr.bf16.mxu1 %v5068_v33  ;;  %v5128_v33 = vld [vmem:[%s6402_s2 + $0x4d0] sm:$0xff]  }
  0x58   :  { %4688 = vmatpush3.bf16.msra.mxu0 %v5069_v34  ;;  %v5129_v34 = vld [vmem:[%s6402_s2 + $0x410] sm:$0xff]  }
  0x59   :  { %4710 = vmatpush3.bf16.msra.mxu1 %v5070_v35  ;;  %4689 = vmatprep.subr.bf16.mxu0 %v5071_v36  ;;  %v5130_v35 = vld [vmem:[%s6402_s2 + $0x490] sm:$0xff]   ;;  %v5131_v36 = vld [vmem:[%s6402_s2 + $0x458] sm:$0xff]  }
  0x5a   :  { %4711 = vmatprep.subr.bf16.mxu1 %v5072_v37  ;;  %v5132_v37 = vld [vmem:[%s6402_s2 + $0x4d8] sm:$0xff]  }
  0x5c   :  { %4690 = vmatpush3.bf16.msra.mxu0 %v5073_v38  ;;  %v5133_v38 = vld [vmem:[%s6402_s2 + $0x418] sm:$0xff]  }
  0x5d   :  { %4712 = vmatpush3.bf16.msra.mxu1 %v5074_v39  ;;  %4691 = vmatprep.subr.bf16.mxu0 %v5075_v40  ;;  %v5134_v39 = vld [vmem:[%s6402_s2 + $0x498] sm:$0xff]   ;;  %v5135_v40 = vld [vmem:[%s6402_s2 + $0x460] sm:$0xff]  }
  0x5e   :  { %4713 = vmatprep.subr.bf16.mxu1 %v5076_v41  ;;  %v5136_v41 = vld [vmem:[%s6402_s2 + $0x4e0] sm:$0xff]  }
  0x60   :  { %4692 = vmatpush3.bf16.msra.mxu0 %v5077_v42  ;;  %v5137_v42 = vld [vmem:[%s6402_s2 + $0x420] sm:$0xff]  }
  0x61   :  { %4714 = vmatpush3.bf16.msra.mxu1 %v5078_v43  ;;  %4721 = vmatprep.subr.bf16.mxu0 %v5083_v50  ;;  %v5138_v43 = vld [vmem:[%s6402_s2 + $0x4a0] sm:$0xff]   ;;  %v5145_v50 = vld [vmem:[%s6402_s2 + $0x430] sm:$0xff]  }
  0x62   :  { %4743 = vmatprep.subr.bf16.mxu1 %v5084_v51  ;;  %v5146_v51 = vld [vmem:[%s6402_s2 + $0x4b0] sm:$0xff]  }
  0x63   :  { %2390 = vmatmul.mubr.bf16.vlgmr.msra.gmra.mrb[8].mxu0 %v4204_v46  ;;  %v5141_v46 = vld [vmem:[%s6402_s2 + $0x428] sm:$0xff]  }
  0x64   :  { %2430 = vmatmul.mubr.bf16.vlgmr.msra.gmra.mrb[8].mxu1 %v4206_v48  ;;  %4722 = vmatpush3.bf16.msra.mxu0 %v5085_v52  ;;  %v5143_v48 = vld [vmem:[%s6402_s2 + $0x470] sm:$0xff]   ;;  %v5147_v52 = vld [vmem:[%s6402_s2 + $0x478] sm:$0xff]  }
  0x65   :  { %4744 = vmatpush3.bf16.msra.mxu1 %v5086_v53  ;;  %4723 = vmatprep.subr.bf16.mxu0 %v5087_v54  ;;  %v5148_v53 = vld [vmem:[%s6402_s2 + $0x4f8] sm:$0xff]  }
  0x66   :  { %4745 = vmatprep.subr.bf16.mxu1 %v5088_v55  ;;  %2469 = vmatprep.mubr.bf16.mxu0 %v4209_v21  ;;  %v5149_v54 = vld [vmem:[%s6402_s2 + $0x438] sm:$0xff]   ;;  %v5178_v21 = vld [vmem:[%s6402_s2 + $0x5a8] sm:$0xff]  }
  0x67   :  { %2509 = vmatprep.mubr.bf16.mxu1 %v4211_v24  ;;  %v5150_v55 = vld [vmem:[%s6402_s2 + $0x4b8] sm:$0xff]   ;;  %v5181_v24 = vld [vmem:[%s6402_s2 + $0x530] sm:$0xff]  }
  0x68   :  { %4724 = vmatpush3.bf16.msra.mxu0 %v5089_v56  ;;  %v29_v56 = vld [vmem:[%s6400_s0 + $0x40] sm:$0xff] }
  0x69   :  { %4746 = vmatpush3.bf16.msra.mxu1 %v5090_v57  ;;  %4725 = vmatprep.subr.bf16.mxu0 %v5091_v58  ;;  %v4212_v57 = vcombine.low %v29_v56, %v29_v56  ;;  %v4213_v58 = vcombine.high %v29_v56, %v29_v56  ;;  %v5211_v56 = vld [vmem:[%s6402_s2 + $0x668] sm:$0xff]  }
  0x6a   :  { %4747 = vmatprep.subr.bf16.mxu1 %v5092_v59  ;;  %v30_v59 = vld [vmem:[%s6400_s0 + $0x48] sm:$0xff] }
  0x6c   :  { %4726 = vmatpush3.bf16.msra.mxu0 %v5093_v60  ;;  %v4214_v60 = vcombine.low %v30_v59, %v30_v59 }
  0x6d   :  { %4748 = vmatpush3.bf16.msra.mxu1 %v5094_v61  ;;  %4727 = vmatprep.subr.bf16.mxu0 %v5095_v62  ;;  %v4215_v61 = vcombine.high %v30_v59, %v30_v59  ;;  %v5155_v62 = vld [vmem:[%s6402_s2 + $0x540] sm:$0xff]   ;;  %v5214_v59 = vld [vmem:[%s6402_s2 + $0x6a8] sm:$0xff]  }
  0x6e   :  { %4749 = vmatprep.subr.bf16.mxu1 %v5096_v63  ;;  %v5156_v63 = vld [vmem:[%s6402_s2 + $0x5c0] sm:$0xff]  }
  0x70   :  { %4728 = vmatpush3.bf16.msra.mxu0 %v5097_v0  ;;  %v5157_v0 = vld [vmem:[%s6402_s2 + $0x500] sm:$0xff]  }
  0x71   :  { %4750 = vmatpush3.bf16.msra.mxu1 %v5098_v1  ;;  %4729 = vmatprep.subr.bf16.mxu0 %v5099_v2  ;;  %v5158_v1 = vld [vmem:[%s6402_s2 + $0x580] sm:$0xff]   ;;  %v5159_v2 = vld [vmem:[%s6402_s2 + $0x548] sm:$0xff]  }
  0x72   :  { %4751 = vmatprep.subr.bf16.mxu1 %v5100_v3  ;;  %v5160_v3 = vld [vmem:[%s6402_s2 + $0x5c8] sm:$0xff]  }
  0x74   :  { %4730 = vmatpush3.bf16.msra.mxu0 %v5101_v4  ;;  %v5161_v4 = vld [vmem:[%s6402_s2 + $0x508] sm:$0xff]  }
  0x75   :  { %4752 = vmatpush3.bf16.msra.mxu1 %v5102_v5  ;;  %4731 = vmatprep.subr.bf16.mxu0 %v5103_v6  ;;  %v5162_v5 = vld [vmem:[%s6402_s2 + $0x588] sm:$0xff]   ;;  %v5163_v6 = vld [vmem:[%s6402_s2 + $0x550] sm:$0xff]  }
  0x76   :  { %4753 = vmatprep.subr.bf16.mxu1 %v5104_v7  ;;  %v5164_v7 = vld [vmem:[%s6402_s2 + $0x5d0] sm:$0xff]  }
  0x78   :  { %4732 = vmatpush3.bf16.msra.mxu0 %v5105_v8  ;;  %v5165_v8 = vld [vmem:[%s6402_s2 + $0x510] sm:$0xff]  }
  0x79   :  { %4754 = vmatpush3.bf16.msra.mxu1 %v5106_v9  ;;  %4733 = vmatprep.subr.bf16.mxu0 %v5107_v10  ;;  %v5166_v9 = vld [vmem:[%s6402_s2 + $0x590] sm:$0xff]   ;;  %v5167_v10 = vld [vmem:[%s6402_s2 + $0x558] sm:$0xff]  }
  0x7a   :  { %4755 = vmatprep.subr.bf16.mxu1 %v5108_v11  ;;  %v5168_v11 = vld [vmem:[%s6402_s2 + $0x5d8] sm:$0xff]  }
  0x7c   :  { %4734 = vmatpush3.bf16.msra.mxu0 %v5109_v12  ;;  %v5169_v12 = vld [vmem:[%s6402_s2 + $0x518] sm:$0xff]  }
  0x7d   :  { %4756 = vmatpush3.bf16.msra.mxu1 %v5110_v13  ;;  %4735 = vmatprep.subr.bf16.mxu0 %v5111_v14  ;;  %v5170_v13 = vld [vmem:[%s6402_s2 + $0x598] sm:$0xff]   ;;  %v5171_v14 = vld [vmem:[%s6402_s2 + $0x560] sm:$0xff]  }
  0x7e   :  { %4757 = vmatprep.subr.bf16.mxu1 %v5112_v15  ;;  %v5172_v15 = vld [vmem:[%s6402_s2 + $0x5e0] sm:$0xff]  }
  0x80   :  { %4736 = vmatpush3.bf16.msra.mxu0 %v5113_v16  ;;  %v5173_v16 = vld [vmem:[%s6402_s2 + $0x520] sm:$0xff]  }
  0x81   :  { %4758 = vmatpush3.bf16.msra.mxu1 %v5114_v17  ;;  %4765 = vmatprep.subr.bf16.mxu0 %v5119_v23  ;;  %v5174_v17 = vld [vmem:[%s6402_s2 + $0x5a0] sm:$0xff]   ;;  %v5180_v23 = vld [vmem:[%s6402_s2 + $0x5f0] sm:$0xff]  }
  0x82   :  { %4787 = vmatprep.subr.bf16.mxu1 %v5120_v25  ;;  %v5182_v25 = vld [vmem:[%s6402_s2 + $0x5b0] sm:$0xff]  }
  0x83   :  { %2470 = vmatmul.mubr.bf16.vlgmr.msra.gmra.mrb[12].mxu0 %v4208_v20  ;;  %v5177_v20 = vld [vmem:[%s6402_s2 + $0x528] sm:$0xff]  }
  0x84   :  { %2510 = vmatmul.mubr.bf16.vlgmr.msra.gmra.mrb[12].mxu1 %v4210_v22  ;;  %4766 = vmatpush3.bf16.msra.mxu0 %v5121_v26  ;;  %v5179_v22 = vld [vmem:[%s6402_s2 + $0x570] sm:$0xff]   ;;  %v5183_v26 = vld [vmem:[%s6402_s2 + $0x578] sm:$0xff]  }
  0x85   :  { %4788 = vmatpush3.bf16.msra.mxu1 %v5122_v27  ;;  %4767 = vmatprep.subr.bf16.mxu0 %v5123_v28  ;;  %v5184_v27 = vld [vmem:[%s6402_s2 + $0x5f8] sm:$0xff]  }
  0x86   :  { %4789 = vmatprep.subr.bf16.mxu1 %v5124_v29  ;;  %2549 = vmatprep.mubr.bf16.mxu0 %v4213_v58  ;;  %v5185_v28 = vld [vmem:[%s6402_s2 + $0x538] sm:$0xff]   ;;  %v5213_v58 = vld [vmem:[%s6402_s2 + $0x628] sm:$0xff]  }
  0x87   :  { %2589 = vmatprep.mubr.bf16.mxu1 %v4215_v61  ;;  %v5186_v29 = vld [vmem:[%s6402_s2 + $0x5b8] sm:$0xff]   ;;  %v5216_v61 = vld [vmem:[%s6402_s2 + $0x6f0] sm:$0xff]  }
  0x88   :  { %4768 = vmatpush3.bf16.msra.mxu0 %v5125_v30  ;;  %v31_v30 = vld [vmem:[%s6400_s0 + $0x50] sm:$0xff] }
  0x89   :  { %4790 = vmatpush3.bf16.msra.mxu1 %v5126_v31  ;;  %4769 = vmatprep.subr.bf16.mxu0 %v5127_v32  ;;  %v32_v31 = vld [vmem:[%s6400_s0 + $0x58] sm:$0xff]  ;;  %v4216_v32 = vcombine.low %v31_v30, %v31_v30 }
  0x8a   :  { %4791 = vmatprep.subr.bf16.mxu1 %v5128_v33  ;;  %v4217_v33 = vcombine.high %v31_v30, %v31_v30  ;;  %v5246_v30 = vld [vmem:[%s6402_s2 + $0x7a0] sm:$0xff]  }
  0x8c   :  { %4770 = vmatpush3.bf16.msra.mxu0 %v5129_v34  ;;  %v4218_v34 = vcombine.low %v32_v31, %v32_v31 }
  0x8d   :  { %4792 = vmatpush3.bf16.msra.mxu1 %v5130_v35  ;;  %4771 = vmatprep.subr.bf16.mxu0 %v5131_v36  ;;  %v4219_v35 = vcombine.high %v32_v31, %v32_v31  ;;  %v5191_v36 = vld [vmem:[%s6402_s2 + $0x640] sm:$0xff]  }
  0x8e   :  { %4793 = vmatprep.subr.bf16.mxu1 %v5132_v37  ;;  %v5192_v37 = vld [vmem:[%s6402_s2 + $0x6c0] sm:$0xff]  }
  0x90   :  { %4772 = vmatpush3.bf16.msra.mxu0 %v5133_v38  ;;  %v5193_v38 = vld [vmem:[%s6402_s2 + $0x600] sm:$0xff]  }
  0x91   :  { %4794 = vmatpush3.bf16.msra.mxu1 %v5134_v39  ;;  %4773 = vmatprep.subr.bf16.mxu0 %v5135_v40  ;;  %v5194_v39 = vld [vmem:[%s6402_s2 + $0x680] sm:$0xff]   ;;  %v5195_v40 = vld [vmem:[%s6402_s2 + $0x648] sm:$0xff]  }
  0x92   :  { %4795 = vmatprep.subr.bf16.mxu1 %v5136_v41  ;;  %v5196_v41 = vld [vmem:[%s6402_s2 + $0x6c8] sm:$0xff]  }
  0x94   :  { %4774 = vmatpush3.bf16.msra.mxu0 %v5137_v42  ;;  %v5197_v42 = vld [vmem:[%s6402_s2 + $0x608] sm:$0xff]  }
  0x95   :  { %4796 = vmatpush3.bf16.msra.mxu1 %v5138_v43  ;;  %4775 = vmatprep.subr.bf16.mxu0 %v5139_v44  ;;  %v5198_v43 = vld [vmem:[%s6402_s2 + $0x688] sm:$0xff]   ;;  %v5199_v44 = vld [vmem:[%s6402_s2 + $0x650] sm:$0xff]  }
  0x96   :  { %4797 = vmatprep.subr.bf16.mxu1 %v5140_v45  ;;  %v5200_v45 = vld [vmem:[%s6402_s2 + $0x6d0] sm:$0xff]  }
  0x98   :  { %4776 = vmatpush3.bf16.msra.mxu0 %v5141_v46  ;;  %v5201_v46 = vld [vmem:[%s6402_s2 + $0x610] sm:$0xff]  }
  0x99   :  { %4798 = vmatpush3.bf16.msra.mxu1 %v5142_v47  ;;  %4777 = vmatprep.subr.bf16.mxu0 %v5143_v48  ;;  %v5202_v47 = vld [vmem:[%s6402_s2 + $0x690] sm:$0xff]   ;;  %v5203_v48 = vld [vmem:[%s6402_s2 + $0x658] sm:$0xff]  }
  0x9a   :  { %4799 = vmatprep.subr.bf16.mxu1 %v5144_v49  ;;  %v5204_v49 = vld [vmem:[%s6402_s2 + $0x6d8] sm:$0xff]  }
  0x9c   :  { %4778 = vmatpush3.bf16.msra.mxu0 %v5145_v50  ;;  %v5205_v50 = vld [vmem:[%s6402_s2 + $0x618] sm:$0xff]  }
  0x9d   :  { %4800 = vmatpush3.bf16.msra.mxu1 %v5146_v51  ;;  %4779 = vmatprep.subr.bf16.mxu0 %v5147_v52  ;;  %v5206_v51 = vld [vmem:[%s6402_s2 + $0x698] sm:$0xff]   ;;  %v5207_v52 = vld [vmem:[%s6402_s2 + $0x660] sm:$0xff]  }
  0x9e   :  { %4801 = vmatprep.subr.bf16.mxu1 %v5148_v53  ;;  %v5208_v53 = vld [vmem:[%s6402_s2 + $0x6e0] sm:$0xff]  }
  0xa0   :  { %4780 = vmatpush3.bf16.msra.mxu0 %v5149_v54  ;;  %v5209_v54 = vld [vmem:[%s6402_s2 + $0x620] sm:$0xff]  }
  0xa1   :  { %4802 = vmatpush3.bf16.msra.mxu1 %v5150_v55  ;;  %4809 = vmatprep.subr.bf16.mxu0 %v5155_v62  ;;  %v5210_v55 = vld [vmem:[%s6402_s2 + $0x6a0] sm:$0xff]   ;;  %v5217_v62 = vld [vmem:[%s6402_s2 + $0x630] sm:$0xff]  }
  0xa2   :  { %4831 = vmatprep.subr.bf16.mxu1 %v5156_v63  ;;  %v5218_v63 = vld [vmem:[%s6402_s2 + $0x6b0] sm:$0xff]  }
  0xa3   :  { %2550 = vmatmul.mubr.bf16.vlgmr.msra.gmra.mrb[16].mxu0 %v4212_v57  ;;  %v5212_v57 = vld [vmem:[%s6402_s2 + $0x6e8] sm:$0xff]  }
  0xa4   :  { %2590 = vmatmul.mubr.bf16.vlgmr.msra.gmra.mrb[16].mxu1 %v4214_v60  ;;  %4810 = vmatpush3.bf16.msra.mxu0 %v5157_v0  ;;  %v5215_v60 = vld [vmem:[%s6402_s2 + $0x670] sm:$0xff]   ;;  %v5219_v0 = vld [vmem:[%s6402_s2 + $0x678] sm:$0xff]  }
  0xa5   :  { %4832 = vmatpush3.bf16.msra.mxu1 %v5158_v1  ;;  %4811 = vmatprep.subr.bf16.mxu0 %v5159_v2  ;;  %v5220_v1 = vld [vmem:[%s6402_s2 + $0x6f8] sm:$0xff]  }
  0xa6   :  { %4833 = vmatprep.subr.bf16.mxu1 %v5160_v3  ;;  %2629 = vmatprep.mubr.bf16.mxu0 %v4217_v33  ;;  %v5221_v2 = vld [vmem:[%s6402_s2 + $0x638] sm:$0xff]   ;;  %v5247_v33 = vld [vmem:[%s6402_s2 + $0x768] sm:$0xff]  }
  0xa7   :  { %2669 = vmatprep.mubr.bf16.mxu1 %v4219_v35  ;;  %v5222_v3 = vld [vmem:[%s6402_s2 + $0x6b8] sm:$0xff]  }
  0xa8   :  { %4812 = vmatpush3.bf16.msra.mxu0 %v5161_v4  ;;  %v33_v4 = vld [vmem:[%s6400_s0 + $0x60] sm:$0xff] }
  0xa9   :  { %4834 = vmatpush3.bf16.msra.mxu1 %v5162_v5  ;;  %4813 = vmatprep.subr.bf16.mxu0 %v5163_v6  ;;  %v34_v5 = vld [vmem:[%s6400_s0 + $0x68] sm:$0xff]  ;;  %v4220_v6 = vcombine.low %v33_v4, %v33_v4 }
  0xaa   :  { %4835 = vmatprep.subr.bf16.mxu1 %v5164_v7  ;;  %v4221_v7 = vcombine.high %v33_v4, %v33_v4 }
  0xac   :  { %4814 = vmatpush3.bf16.msra.mxu0 %v5165_v8  ;;  %v4222_v8 = vcombine.low %v34_v5, %v34_v5 }
  0xad   :  { %4836 = vmatpush3.bf16.msra.mxu1 %v5166_v9  ;;  %4815 = vmatprep.subr.bf16.mxu0 %v5167_v10  ;;  %v5227_v9 = vld [vmem:[%s6402_s2 + $0x740] sm:$0xff]   ;;  %v4223_v10 = vcombine.high %v34_v5, %v34_v5 }
  0xae   :  { %4837 = vmatprep.subr.bf16.mxu1 %v5168_v11  ;;  %v5228_v11 = vld [vmem:[%s6402_s2 + $0x7c0] sm:$0xff]  }
  0xb0   :  { %4816 = vmatpush3.bf16.msra.mxu0 %v5169_v12  ;;  %v5229_v12 = vld [vmem:[%s6402_s2 + $0x700] sm:$0xff]  }
  0xb1   :  { %4838 = vmatpush3.bf16.msra.mxu1 %v5170_v13  ;;  %4817 = vmatprep.subr.bf16.mxu0 %v5171_v14  ;;  %v5230_v13 = vld [vmem:[%s6402_s2 + $0x780] sm:$0xff]   ;;  %v5231_v14 = vld [vmem:[%s6402_s2 + $0x748] sm:$0xff]  }
  0xb2   :  { %4839 = vmatprep.subr.bf16.mxu1 %v5172_v15  ;;  %v5232_v15 = vld [vmem:[%s6402_s2 + $0x7c8] sm:$0xff]  }
  0xb4   :  { %4818 = vmatpush3.bf16.msra.mxu0 %v5173_v16  ;;  %v5233_v16 = vld [vmem:[%s6402_s2 + $0x708] sm:$0xff]  }
  0xb5   :  { %4840 = vmatpush3.bf16.msra.mxu1 %v5174_v17  ;;  %4819 = vmatprep.subr.bf16.mxu0 %v5175_v18  ;;  %v5234_v17 = vld [vmem:[%s6402_s2 + $0x788] sm:$0xff]   ;;  %v5235_v18 = vld [vmem:[%s6402_s2 + $0x750] sm:$0xff]  }
  0xb6   :  { %4841 = vmatprep.subr.bf16.mxu1 %v5176_v19  ;;  %v5236_v19 = vld [vmem:[%s6402_s2 + $0x7d0] sm:$0xff]  }
  0xb8   :  { %4820 = vmatpush3.bf16.msra.mxu0 %v5177_v20  ;;  %v5237_v20 = vld [vmem:[%s6402_s2 + $0x710] sm:$0xff]  }
  0xb9   :  { %4842 = vmatpush3.bf16.msra.mxu1 %v5178_v21  ;;  %4821 = vmatprep.subr.bf16.mxu0 %v5179_v22  ;;  %v5238_v21 = vld [vmem:[%s6402_s2 + $0x790] sm:$0xff]   ;;  %v5239_v22 = vld [vmem:[%s6402_s2 + $0x758] sm:$0xff]  }
  0xba   :  { %4843 = vmatprep.subr.bf16.mxu1 %v5180_v23  ;;  %v5240_v23 = vld [vmem:[%s6402_s2 + $0x7d8] sm:$0xff]  }
  0xbc   :  { %4822 = vmatpush3.bf16.msra.mxu0 %v5181_v24  ;;  %v5241_v24 = vld [vmem:[%s6402_s2 + $0x718] sm:$0xff]  }
  0xbd   :  { %4844 = vmatpush3.bf16.msra.mxu1 %v5182_v25  ;;  %4823 = vmatprep.subr.bf16.mxu0 %v5183_v26  ;;  %v5242_v25 = vld [vmem:[%s6402_s2 + $0x798] sm:$0xff]   ;;  %v5243_v26 = vld [vmem:[%s6402_s2 + $0x760] sm:$0xff]  }
  0xbe   :  { %4845 = vmatprep.subr.bf16.mxu1 %v5184_v27  ;;  %v5244_v27 = vld [vmem:[%s6402_s2 + $0x7e0] sm:$0xff]  }
  0xc0   :  { %4824 = vmatpush3.bf16.msra.mxu0 %v5185_v28  ;;  %v5245_v28 = vld [vmem:[%s6402_s2 + $0x720] sm:$0xff]  }
  0xc1   :  { %4846 = vmatpush3.bf16.msra.mxu1 %v5186_v29  ;;  %4853 = vmatprep.subr.bf16.mxu0 %v5191_v36  ;;  %v5248_v36 = vld [vmem:[%s6402_s2 + $0x7e8] sm:$0xff]  }
  0xc2   :  { %4875 = vmatprep.subr.bf16.mxu1 %v5192_v37 }
  0xc3   :  { %2630 = vmatmul.mubr.bf16.vlgmr.msra.gmra.mrb[20].mxu0 %v4216_v32 }
  0xc4   :  { %2670 = vmatmul.mubr.bf16.vlgmr.msra.gmra.mrb[20].mxu1 %v4218_v34  ;;  %4854 = vmatpush3.bf16.msra.mxu0 %v5193_v38 }
  0xc5   :  { %4876 = vmatpush3.bf16.msra.mxu1 %v5194_v39  ;;  %4855 = vmatprep.subr.bf16.mxu0 %v5195_v40  ;;  %v5249_v40 = vld [vmem:[%s6402_s2 + $0x728] sm:$0xff]  }
  0xc6   :  { %4877 = vmatprep.subr.bf16.mxu1 %v5196_v41  ;;  %2709 = vmatprep.mubr.bf16.mxu0 %v4221_v7 }
  0xc7   :  { %2749 = vmatprep.mubr.bf16.mxu1 %v4223_v10 }
  0xc8   :  { %4856 = vmatpush3.bf16.msra.mxu0 %v5197_v42 }
  0xc9   :  { %4878 = vmatpush3.bf16.msra.mxu1 %v5198_v43  ;;  %4857 = vmatprep.subr.bf16.mxu0 %v5199_v44  ;;  %v5250_v43 = vld [vmem:[%s6402_s2 + $0x7a8] sm:$0xff]  }
  0xca   :  { %4879 = vmatprep.subr.bf16.mxu1 %v5200_v45  ;;  %v5251_v45 = vld [vmem:[%s6402_s2 + $0x770] sm:$0xff]  }
  0xcc   :  { %4858 = vmatpush3.bf16.msra.mxu0 %v5201_v46  ;;  %v5252_v46 = vld [vmem:[%s6402_s2 + $0x7f0] sm:$0xff]  }
  0xcd   :  { %4880 = vmatpush3.bf16.msra.mxu1 %v5202_v47  ;;  %4859 = vmatprep.subr.bf16.mxu0 %v5203_v48  ;;  %v5253_v47 = vld [vmem:[%s6402_s2 + $0x730] sm:$0xff]  }
  0xce   :  { %4881 = vmatprep.subr.bf16.mxu1 %v5204_v49  ;;  %v5254_v48 = vld [vmem:[%s6402_s2 + $0x7b0] sm:$0xff]   ;;  %v5255_v49 = vld [vmem:[%s6402_s2 + $0x778] sm:$0xff]  }
  0xd0   :  { %4860 = vmatpush3.bf16.msra.mxu0 %v5205_v50  ;;  %v5256_v50 = vld [vmem:[%s6402_s2 + $0x7f8] sm:$0xff]  }
  0xd1   :  { %4882 = vmatpush3.bf16.msra.mxu1 %v5206_v51  ;;  %4861 = vmatprep.subr.bf16.mxu0 %v5207_v52  ;;  %v5257_v51 = vld [vmem:[%s6402_s2 + $0x738] sm:$0xff]  }
  0xd2   :  { %4883 = vmatprep.subr.bf16.mxu1 %v5208_v53  ;;  %v5258_v52 = vld [vmem:[%s6402_s2 + $0x7b8] sm:$0xff]   ;;  %v35_v53 = vld [vmem:[%s6400_s0 + $0x70] sm:$0xff] }
  0xd4   :  { %4862 = vmatpush3.bf16.msra.mxu0 %v5209_v54  ;;  %v36_v54 = vld [vmem:[%s6400_s0 + $0x78] sm:$0xff] }
  0xd5   :  { %4884 = vmatpush3.bf16.msra.mxu1 %v5210_v55  ;;  %4863 = vmatprep.subr.bf16.mxu0 %v5211_v56 }
  0xd6   :  { %4885 = vmatprep.subr.bf16.mxu1 %v5212_v57 }
  0xd8   :  { %4864 = vmatpush3.bf16.msra.mxu0 %v5213_v58 }
  0xd9   :  { %4886 = vmatpush3.bf16.msra.mxu1 %v5214_v59  ;;  %4865 = vmatprep.subr.bf16.mxu0 %v5215_v60 }
  0xda   :  { %4887 = vmatprep.subr.bf16.mxu1 %v5216_v61 }
  0xdc   :  { %4866 = vmatpush3.bf16.msra.mxu0 %v5217_v62 }
  0xdd   :  { %4888 = vmatpush3.bf16.msra.mxu1 %v5218_v63  ;;  %4867 = vmatprep.subr.bf16.mxu0 %v5219_v0 }
  0xde   :  { %4889 = vmatprep.subr.bf16.mxu1 %v5220_v1 }
  0xe0   :  { %4868 = vmatpush3.bf16.msra.mxu0 %v5221_v2 }
  0xe1   :  { %4890 = vmatpush3.bf16.msra.mxu1 %v5222_v3  ;;  %4897 = vmatprep.subr.bf16.mxu0 %v5227_v9 }
  0xe2   :  { %4919 = vmatprep.subr.bf16.mxu1 %v5228_v11 }
  0xe3   :  { %2710 = vmatmul.mubr.bf16.vlgmr.msra.gmra.mrb[24].mxu0 %v4220_v6 }
  0xe4   :  { %2750 = vmatmul.mubr.bf16.vlgmr.msra.gmra.mrb[24].mxu1 %v4222_v8  ;;  %4898 = vmatpush3.bf16.msra.mxu0 %v5229_v12 }
  0xe5   :  { %4920 = vmatpush3.bf16.msra.mxu1 %v5230_v13  ;;  %4899 = vmatprep.subr.bf16.mxu0 %v5231_v14 }
  0xe6   :  { %4921 = vmatprep.subr.bf16.mxu1 %v5232_v15 }
  0xe8   :  { %4900 = vmatpush3.bf16.msra.mxu0 %v5233_v16 }
  0xe9   :  { %4922 = vmatpush3.bf16.msra.mxu1 %v5234_v17  ;;  %4901 = vmatprep.subr.bf16.mxu0 %v5235_v18 }
  0xea   :  { %4923 = vmatprep.subr.bf16.mxu1 %v5236_v19 }
  0xec   :  { %4902 = vmatpush3.bf16.msra.mxu0 %v5237_v20 }
  0xed   :  { %4924 = vmatpush3.bf16.msra.mxu1 %v5238_v21  ;;  %4903 = vmatprep.subr.bf16.mxu0 %v5239_v22 }
  0xee   :  { %4925 = vmatprep.subr.bf16.mxu1 %v5240_v23 }
  0xf0   :  { %4904 = vmatpush3.bf16.msra.mxu0 %v5241_v24 }
  0xf1   :  { %4926 = vmatpush3.bf16.msra.mxu1 %v5242_v25  ;;  %4905 = vmatprep.subr.bf16.mxu0 %v5243_v26 }
  0xf2   :  { %4927 = vmatprep.subr.bf16.mxu1 %v5244_v27 }
  0xf4   :  { %4906 = vmatpush3.bf16.msra.mxu0 %v5245_v28 }
  0xf5   :  { %4928 = vmatpush3.bf16.msra.mxu1 %v5246_v30  ;;  %4907 = vmatprep.subr.bf16.mxu0 %v5247_v33 }
  0xf6   :  { %v4605_v29 = vpop.f32.mrb[0].mxu0  ;;  %4929 = vmatprep.subr.bf16.mxu1 %v5248_v36 }
  0xf7   :  { %v4627_v31 = vpop.f32.mrb[0].mxu1  ;;  %v4606_v32 = vpop.f32.mrb[1].mxu0 }
  0xf8   :  { %v4607_v34 = vadd.f32 %v4606_v32, %v4605_v29  ;;  %v4628_v35 = vpop.f32.mrb[1].mxu1  ;;  %v4608_v38 = vpop.f32.mrb[2].mxu0  ;;  %4908 = vmatpush3.bf16.msra.mxu0 %v5249_v40 }
  0xf9   :  { %v4629_v37 = vadd.f32 %v4628_v35, %v4627_v31  ;;  %v4630_v39 = vpop.f32.mrb[2].mxu1  ;;  %v4609_v41 = vpop.f32.mrb[3].mxu0  ;;  %4930 = vmatpush3.bf16.msra.mxu1 %v5250_v43  ;;  %4909 = vmatprep.subr.bf16.mxu0 %v5251_v45 }
  0xfa   :  { %v4631_v44 = vpop.f32.mrb[3].mxu1  ;;  %4931 = vmatprep.subr.bf16.mxu1 %v5252_v46 }
  0xfb   :  { %v2272_v42 = vadd.f32 %v4629_v37, %v4607_v34 }
  0xfc   :  { %4910 = vmatpush3.bf16.msra.mxu0 %v5253_v47 }
  0xfd   :  { %4932 = vmatpush3.bf16.msra.mxu1 %v5254_v48  ;;  %4911 = vmatprep.subr.bf16.mxu0 %v5255_v49 }
  0xfe   :  { %4933 = vmatprep.subr.bf16.mxu1 %v5256_v50 }
  0xff   :  { %11 = vsyncpa [#allocation5], 0  ;;  %v4224_v55 = vcombine.low %v35_v53, %v35_v53  ;;  %v4225_v56 = vcombine.high %v35_v53, %v35_v53  ;;  %v4226_v57 = vcombine.low %v36_v54, %v36_v54  ;;  %v4227_v58 = vcombine.high %v36_v54, %v36_v54  ;;  %v2840_v31 = vld [vmem:[%s6401_s1] sm:$0xff] }
 0x100   :  { %4912 = vmatpush3.bf16.msra.mxu0 %v5257_v51  ;;  %v5327_v32 = vmov 0.0   ;;  %vm5328_vm0 = vmmov 0   ;;  %vm2837_vm1 = vcmask 64512   ;;  %vm2914_vm2 = vcmask 60416  }
 0x101   :  { %4934 = vmatpush3.bf16.msra.mxu1 %v5258_v52  ;;  %2789 = vmatprep.mubr.bf16.mxu0 %v4225_v56  ;;  %vm3279_vm3 = vcmask 1043456   ;;  %vm3004_vm4 = vcmask 58368   ;;  %vm3177_vm5 = vcmask 60418  }
 0x102   :  { %2829 = vmatprep.mubr.bf16.mxu1 %v4227_v58  ;;  %4949 = vmatprep.subr.mxu0 %v5327_v32 }
 0x103   :  { %2790 = vmatmul.mubr.bf16.vlgmr.msra.gmra.mrb[28].mxu0 %v4224_v55  ;;  %4954 = vmatprep.subr.mxu1 %v5327_v32 }
 0x104   :  { %2830 = vmatmul.mubr.bf16.vlgmr.msra.gmra.mrb[28].mxu1 %v4226_v57  ;;  %4951 = vmatprep.mubr.msk.f32.mxu0 %vm5328_vm0, %v5327_v32 }
 0x105   :  { %4950 = vmatpush3.msra.mxu0 %v2840_v31  ;;  %4956 = vmatprep.mubr.msk.f32.mxu1 %vm5328_vm0, %v5327_v32 }
 0x106   :  { %4959 = vmatprep.subr.mxu0 %v5327_v32 }
 0x10a   :  { %4955 = vmatpush3.xpose.msk.msra.mxu1 %vm2837_vm1, %v2840_v31 }
 0x10b   :  { %4964 = vmatprep.subr.mxu1 %v5327_v32 }
 0x116   :  { %v4649_v59 = vpop.f32.mrb[4].mxu0 }
 0x117   :  { %v4671_v60 = vpop.f32.mrb[4].mxu1  ;;  %v4650_v61 = vpop.f32.mrb[5].mxu0 }
 0x118   :  { %v4672_v62 = vpop.f32.mrb[5].mxu1  ;;  %v4651_v63 = vadd.f32 %v4650_v61, %v4649_v59  ;;  %v4652_v1 = vpop.f32.mrb[6].mxu0 }
 0x119   :  { %v4673_v0 = vadd.f32 %v4672_v62, %v4671_v60  ;;  %v4674_v2 = vpop.f32.mrb[6].mxu1  ;;  %v4653_v3 = vpop.f32.mrb[7].mxu0 }
 0x11a   :  { %v4675_v4 = vpop.f32.mrb[7].mxu1  ;;  %v2312_v5 = vadd.f32 %v4651_v63, %v2272_v42 }
 0x11c   :  { %v2352_v6 = vadd.f32 %v4673_v0, %v2312_v5 }
 0x136   :  { %v4693_v7 = vpop.f32.mrb[8].mxu0 }
 0x137   :  { %v4715_v8 = vpop.f32.mrb[8].mxu1  ;;  %v4694_v9 = vpop.f32.mrb[9].mxu0 }
 0x138   :  { %v4695_v10 = vadd.f32 %v4694_v9, %v4693_v7  ;;  %v4716_v11 = vpop.f32.mrb[9].mxu1  ;;  %v4696_v12 = vpop.f32.mrb[10].mxu0 }
 0x139   :  { %v4717_v13 = vadd.f32 %v4716_v11, %v4715_v8  ;;  %v4718_v14 = vpop.f32.mrb[10].mxu1  ;;  %v4697_v15 = vpop.f32.mrb[11].mxu0 }
 0x13a   :  { %v2392_v16 = vadd.f32 %v4695_v10, %v2352_v6  ;;  %v4719_v17 = vpop.f32.mrb[11].mxu1 }
 0x13b   :  { %v4487_v17 = vld [vmem:[%s6401_s1 + $0x8] sm:$0xff] }
 0x13c   :  { %v2432_v18 = vadd.f32 %v4717_v13, %v2392_v16 }
 0x156   :  { %v4737_v19 = vpop.f32.mrb[12].mxu0 }
 0x157   :  { %v4759_v20 = vpop.f32.mrb[12].mxu1  ;;  %v4738_v21 = vpop.f32.mrb[13].mxu0 }
 0x158   :  { %v4739_v22 = vadd.f32 %v4738_v21, %v4737_v19  ;;  %v4760_v23 = vpop.f32.mrb[13].mxu1  ;;  %v4740_v24 = vpop.f32.mrb[14].mxu0 }
 0x159   :  { %v4761_v25 = vadd.f32 %v4760_v23, %v4759_v20  ;;  %v4762_v26 = vpop.f32.mrb[14].mxu1  ;;  %v4741_v27 = vpop.f32.mrb[15].mxu0 }
 0x15a   :  { %v2472_v28 = vadd.f32 %v4739_v22, %v2432_v18  ;;  %v4763_v29 = vpop.f32.mrb[15].mxu1 }
 0x15c   :  { %v2512_v30 = vadd.f32 %v4761_v25, %v2472_v28 }
 0x176   :  { %v4781_v33 = vpop.f32.mrb[16].mxu0 }
 0x177   :  { %v4803_v34 = vpop.f32.mrb[16].mxu1  ;;  %v4782_v35 = vpop.f32.mrb[17].mxu0 }
 0x178   :  { %v4804_v36 = vpop.f32.mrb[17].mxu1  ;;  %v4783_v37 = vadd.f32 %v4782_v35, %v4781_v33  ;;  %v4784_v39 = vpop.f32.mrb[18].mxu0 }
 0x179   :  { %v4805_v38 = vadd.f32 %v4804_v36, %v4803_v34  ;;  %v4806_v40 = vpop.f32.mrb[18].mxu1  ;;  %v4785_v41 = vpop.f32.mrb[19].mxu0 }
 0x17a   :  { %v4807_v42 = vpop.f32.mrb[19].mxu1  ;;  %v2552_v43 = vadd.f32 %v4783_v37, %v2512_v30 }
 0x17c   :  { %v2592_v44 = vadd.f32 %v4805_v38, %v2552_v43  ;;  %v3180_v43 = vld [vmem:[%s6403_s3] sm:$0xff] }
 0x196   :  { %v4825_v45 = vpop.f32.mrb[20].mxu0 }
 0x197   :  { %v4847_v46 = vpop.f32.mrb[20].mxu1  ;;  %v4826_v47 = vpop.f32.mrb[21].mxu0 }
 0x198   :  { %v4827_v48 = vadd.f32 %v4826_v47, %v4825_v45  ;;  %v4848_v49 = vpop.f32.mrb[21].mxu1  ;;  %v4828_v50 = vpop.f32.mrb[22].mxu0  ;;  %v4493_v45 = vcombine.high %v3180_v43, %v3180_v43  ;;  %v4492_v47 = vcombine.low %v3180_v43, %v3180_v43  ;;  %v3195_v43 = vld [vmem:[%s6403_s3 + $0x78] sm:$0xff] }
 0x199   :  { %v4849_v51 = vadd.f32 %v4848_v49, %v4847_v46  ;;  %v4850_v52 = vpop.f32.mrb[22].mxu1  ;;  %v4829_v53 = vpop.f32.mrb[23].mxu0  ;;  %v3182_v50 = vld [vmem:[%s6403_s3 + $0x10] sm:$0xff] }
 0x19a   :  { %v2632_v54 = vadd.f32 %v4827_v48, %v2592_v44  ;;  %v4851_v55 = vpop.f32.mrb[23].mxu1  ;;  %v3181_v44 = vld [vmem:[%s6403_s3 + $0x8] sm:$0xff]  ;;  %v5329_v52 = vmov 0   ;;  %v4497_v53 = vcombine.high %v3182_v50, %v3182_v50 }
 0x19b   :  { %v4495_v46 = vcombine.high %v3181_v44, %v3181_v44  ;;  %v4494_v48 = vcombine.low %v3181_v44, %v3181_v44 }
 0x19c   :  { %v2672_v56 = vadd.f32 %v4849_v51, %v2632_v54  ;;  %v3183_v51 = vld [vmem:[%s6403_s3 + $0x18] sm:$0xff] }
 0x19d   :  { %v3287_v49 = vsel %vm3279_vm3, %v4494_v48, 0  ;;  %v4499_v54 = vcombine.high %v3183_v51, %v3183_v51 }
 0x1b6   :  { %v4869_v57 = vpop.f32.mrb[24].mxu0 }
 0x1b7   :  { %v4891_v58 = vpop.f32.mrb[24].mxu1  ;;  %v4870_v59 = vpop.f32.mrb[25].mxu0 }
 0x1b8   :  { %v4871_v60 = vadd.f32 %v4870_v59, %v4869_v57  ;;  %v4892_v61 = vpop.f32.mrb[25].mxu1  ;;  %v4872_v62 = vpop.f32.mrb[26].mxu0 }
 0x1b9   :  { %v4893_v63 = vadd.f32 %v4892_v61, %v4891_v58  ;;  %v4894_v0 = vpop.f32.mrb[26].mxu1  ;;  %v4873_v1 = vpop.f32.mrb[27].mxu0  ;;  %v4496_v62 = vcombine.low %v3182_v50, %v3182_v50 }
 0x1ba   :  { %v2712_v2 = vadd.f32 %v4871_v60, %v2672_v56  ;;  %v4895_v3 = vpop.f32.mrb[27].mxu1  ;;  %v3184_v0 = vld [vmem:[%s6403_s3 + $0x20] sm:$0xff]  ;;  %v3185_v1 = vld [vmem:[%s6403_s3 + $0x28] sm:$0xff] }
 0x1bc   :  { %v2752_v4 = vadd.f32 %v4893_v63, %v2712_v2  ;;  %v4498_v63 = vcombine.low %v3183_v51, %v3183_v51  ;;  %v3293_v2 = vsel %vm3279_vm3, %v4496_v62, 0 }
 0x1be   :  { %v3299_v3 = vsel %vm3279_vm3, %v4498_v63, 0 }
 0x1d6   :  { %v4913_v5 = vpop.f32.mrb[28].mxu0 }
 0x1d7   :  { %v4935_v6 = vpop.f32.mrb[28].mxu1  ;;  %v4914_v7 = vpop.f32.mrb[29].mxu0 }
 0x1d8   :  { %v4915_v8 = vadd.f32 %v4914_v7, %v4913_v5  ;;  %v4936_v9 = vpop.f32.mrb[29].mxu1  ;;  %v4916_v10 = vpop.f32.mrb[30].mxu0  ;;  %v4501_v5 = vcombine.high %v3184_v0, %v3184_v0  ;;  %v4500_v7 = vcombine.low %v3184_v0, %v3184_v0 }
 0x1d9   :  { %v4937_v11 = vadd.f32 %v4936_v9, %v4935_v6  ;;  %v4938_v12 = vpop.f32.mrb[30].mxu1  ;;  %v4917_v13 = vpop.f32.mrb[31].mxu0  ;;  %v4503_v6 = vcombine.high %v3185_v1, %v3185_v1  ;;  %v3186_v9 = vld [vmem:[%s6403_s3 + $0x30] sm:$0xff]  ;;  %v3187_v10 = vld [vmem:[%s6403_s3 + $0x38] sm:$0xff] }
 0x1da   :  { %v2792_v14 = vadd.f32 %v4915_v8, %v2752_v4  ;;  %v4939_v15 = vpop.f32.mrb[31].mxu1  ;;  %v4502_v8 = vcombine.low %v3185_v1, %v3185_v1  ;;  %v4505_v13 = vcombine.high %v3186_v9, %v3186_v9 }
 0x1db   :  { %v4504_v15 = vcombine.low %v3186_v9, %v3186_v9 }
 0x1dc   :  { %v2832_v16 = vadd.f32 %v4937_v11, %v2792_v14  ;;  %v3305_v11 = vsel %vm3279_vm3, %v4500_v7, 0  ;;  %v3311_v12 = vsel %vm3279_vm3, %v4502_v8, 0  ;;  %v4507_v14 = vcombine.high %v3187_v10, %v3187_v10 }
 0x1de   :  { %2838 = vst.msk [vmem:[#allocation2] sm:$0xff] %vm2837_vm1, %v2832_v16  ;;  %v4506_v16 = vcombine.low %v3187_v10, %v3187_v10 }
 0x1e5   :  { %v2839_v18 = vld [vmem:[#allocation2] sm:$0xf]  ;;  %v3006_v19 = vld [vmem:[#allocation2 + $0x4] sm:$0xf] }
 0x1e6   :  { %4952 = vmatmul.mubr.msk.f32.vlgmr.msra.gmra.mrb[32].mxu0 %vm2837_vm1, %v2839_v18  ;;  %v3189_v18 = vld [vmem:[%s6403_s3 + $0x48] sm:$0xff] }
 0x1e7   :  { %4960 = vmatpush3.msra.mxu0 %v4487_v17  ;;  %4961 = vmatprep.mubr.msk.f32.mxu0 %vm5328_vm0, %v5327_v32 }
 0x1e8   :  { %4524 = vmatprep.subr.msk.bf16.mxu0 %vm3279_vm3, %v4493_v45 }
 0x1ea   :  { %4962 = vmatmul.mubr.msk.f32.vlgmr.msra.gmra.mrb[34].mxu0 %vm2837_vm1, %v3006_v19  ;;  %v3317_v19 = vsel %vm3279_vm3, %v4504_v15, 0 }
 0x1eb   :  { %3408 = vmatprep.mubr.bf16.mxu0 %v5329_v52 }
 0x2b9   :  { %v2910_v20 = vpop.f32.mrb[32].mxu0 }
 0x2ba   :  { %v4953_v21 = vpop.f32.mrb[33].mxu0  ;;  %v2915_v22 = vsel %vm2914_vm2, %v2910_v20, -inf }
 0x2bb   :  { %2916 = vmax.xlane.f32.xlu0 %v2915_v22  ;;  %v4511_v22 = vcombine.high %v3189_v18, %v3189_v18 }
 0x2bd   :  { %v3078_v23 = vpop.f32.mrb[34].mxu0 }
 0x2be   :  { %v4963_v24 = vpop.f32.mrb[35].mxu0  ;;  %v3082_v25 = vsel %vm2914_vm2, %v3078_v23, -inf }
 0x2bf   :  { %3083 = vmax.xlane.f32.xlu0 %v3082_v25  ;;  %v4510_v24 = vcombine.low %v3189_v18, %v3189_v18  ;;  %v3190_v25 = vld [vmem:[%s6403_s3 + $0x50] sm:$0xff] }
 0x348   :  { %v2917_v26 = vpop.xlane.xlu0 %2916 }
 0x349   :  { %v2918_v27 = vsub.f32 %v2910_v20, %v2917_v26  ;;  %v3323_v20 = vsel %vm3279_vm3, %v4506_v16, 0  ;;  %v3191_v26 = vld [vmem:[%s6403_s3 + $0x58] sm:$0xff] }
 0x34b   :  { %v2919_v28 = vmul.f32 1.442695, %v2918_v27 }
 0x34c   :  { %v3084_v29 = vpop.xlane.xlu0 %3083 }
 0x34d   :  { %5295 = vpow2.f32 %v2919_v28  ;;  %v3085_v30 = vsub.f32 %v3078_v23, %v3084_v29  ;;  %v3335_v28 = vsel %vm3279_vm3, %v4510_v24, 0  ;;  %v4513_v29 = vcombine.high %v3190_v25, %v3190_v25 }
 0x34f   :  { %v3086_v31 = vmul.f32 1.442695, %v3085_v30  ;;  %v4515_v30 = vcombine.high %v3191_v26, %v3191_v26 }
 0x351   :  { %5297 = vpow2.f32 %v3086_v31  ;;  %v4512_v31 = vcombine.low %v3190_v25, %v3190_v25 }
 0x357   :  { %v5296_v33 = vpop.eup %5295 }
 0x358   :  { %v2921_v34 = vsel %vm2914_vm2, %v5296_v33, 0.0 }
 0x359   :  { %2922 = vadd.xlane.f32.xlu1 %v2921_v34  ;;  %v3192_v34 = vld [vmem:[%s6403_s3 + $0x60] sm:$0xff] }
 0x35b   :  { %v5298_v35 = vpop.eup %5297 }
 0x35c   :  { %v3088_v36 = vsel %vm2914_vm2, %v5298_v35, 0.0 }
 0x35d   :  { %3089 = vadd.xlane.f32.xlu1 %v3088_v36  ;;  %v3341_v36 = vsel %vm3279_vm3, %v4512_v31, 0 }
 0x3e6   :  { %v2923_v37 = vpop.xlane.xlu1 %2922 }
 0x3e7   :  { %5299 = vrcp.f32 %v2923_v37 }
 0x3ea   :  { %v3090_v38 = vpop.xlane.xlu1 %3089 }
 0x3eb   :  { %5301 = vrcp.f32 %v3090_v38  ;;  %v4517_v38 = vcombine.high %v3192_v34, %v3192_v34 }
 0x3f1   :  { %v5300_v39 = vpop.eup %5299 }
 0x3f2   :  { %v2925_v40 = vmul.f32 %v5300_v39, %v5296_v33  ;;  %v4514_v33 = vcombine.low %v3191_v26, %v3191_v26 }
 0x3f4   :  { %2926 = vst.msk [vmem:[#allocation4] sm:$0xf] %vm2914_vm2, %v2925_v40  ;;  %4957 = vmatmul.mubr.msk.f32.vlgmr.msra.gmra.mrb[32].mxu1 %vm2837_vm1, %v2925_v40  ;;  %v3347_v37 = vsel %vm3279_vm3, %v4514_v33, 0  ;;  %v4516_v40 = vcombine.low %v3192_v34, %v3192_v34 }
 0x3f5   :  { %v5302_v41 = vpop.eup %5301  ;;  %4965 = vmatpush3.xpose.msk.msra.mxu1 %vm2837_vm1, %v4487_v17  ;;  %4966 = vmatprep.mubr.msk.f32.mxu1 %vm5328_vm0, %v5327_v32  ;;  %v3281_v32 = vsel %vm3279_vm3, %v4492_v47, 0  ;;  %v3188_v17 = vld [vmem:[%s6403_s3 + $0x40] sm:$0xff]  ;;  %v4523_v47 = vcombine.high %v3195_v43, %v3195_v43 }
 0x3f6   :  { %v3092_v42 = vmul.f32 %v5302_v41, %v5298_v35  ;;  %4526 = vmatprep.subr.msk.bf16.mxu1 %vm3279_vm3, %v4495_v46  ;;  %3377 = vmatpush1.bf16.msra.mxu0 %v3281_v32  ;;  %v4509_v21 = vcombine.high %v3188_v17, %v3188_v17  ;;  %v4508_v23 = vcombine.low %v3188_v17, %v3188_v17  ;;  %v3193_v35 = vld [vmem:[%s6403_s3 + $0x68] sm:$0xff]  ;;  %v3353_v44 = vsel %vm3279_vm3, %v4516_v40, 0 }
 0x3f7   :  { %4528 = vmatprep.subr.msk.bf16.mxu0 %vm3279_vm3, %v4497_v53  ;;  %v4519_v39 = vcombine.high %v3193_v35, %v3193_v35  ;;  %v4518_v41 = vcombine.low %v3193_v35, %v3193_v35  ;;  %v4522_v32 = vcombine.low %v3195_v43, %v3195_v43 }
 0x3f8   :  { %3094 = vst.msk [vmem:[#allocation4 + $0x4] sm:$0xf] %vm2914_vm2, %v3092_v42  ;;  %4967 = vmatmul.mubr.msk.f32.vlgmr.msra.gmra.mrb[34].mxu1 %vm2837_vm1, %v3092_v42  ;;  %v3329_v27 = vsel %vm3279_vm3, %v4508_v23, 0  ;;  %v3194_v42 = vld [vmem:[%s6403_s3 + $0x70] sm:$0xff]  ;;  %s5330_s3 = smov [#allocation4]  }
 0x3f9   :  { %3418 = vmatpush1.bf16.msra.mxu1 %v3287_v49  ;;  %3449 = vmatprep.mubr.bf16.mxu1 %v5329_v52  ;;  %v3359_v45 = vsel %vm3279_vm3, %v4518_v41, 0  ;;  %v4521_v46 = vcombine.high %v3194_v42, %v3194_v42  ;;  %v4520_v48 = vcombine.low %v3194_v42, %v3194_v42  ;;  %v3371_v50 = vsel %vm3279_vm3, %v4522_v32, 0  ;;  %s4181_s17 = sshll.u32 %s5330_s3, 4  ;;  %s4182_s17 = int_to_ptr.vmem [resolvable:$true] %s4181_s17 }
 0x3fa   :  { %4530 = vmatprep.subr.msk.bf16.mxu1 %vm3279_vm3, %v4499_v54  ;;  %s5303_s18 = scalar_lea.vmem %s4182_s17, 128  ;;  %p5308_p1 = scmp.lt.s32.totalorder %s4182_s17, %s4182_s17 }
 0x3fb   :  { %v3365_v49 = vsel %vm3279_vm3, %v4520_v48, 0  ;;  %p5304_p0 = scmp.ne.s32.totalorder %s4182_s17, %s5303_s18  ;;  %p5309_p2 = scmp.lt.s32.totalorder %s5303_s18, %s5303_s18 }
 0x3fd   :  { %p5310_p3 = por %p5309_p2, %p5308_p1 }
 0x3ff   :  { %p5311_p4 = pnand %p5310_p3, %p5304_p0 }
 0x4c7   :  { %v2999_v55 = vpop.f32.mrb[32].mxu1 }
 0x4c8   :  { %v3003_v56 = vpack.c.bf16 %v2999_v55, %v2999_v55  ;;  %v4958_v57 = vpop.f32.mrb[33].mxu1 }
 0x4ca   :  { %3005 = vst.msk [vmem:[#allocation3] sm:$0x3] %vm3004_vm4, %v3003_v56 }
 0x4cb   :  { %v3167_v58 = vpop.f32.mrb[34].mxu1 }
 0x4cc   :  { %v4572_v59 = vpack.c.bf16 %v3167_v58, %v3167_v58  ;;  %v4968_v60 = vpop.f32.mrb[35].mxu1 }
 0x4ce   :  { %v3175_v61 = vrot.slane %v4572_v59, 6 }
 0x4d0   :  { %3178 = vst.msk [vmem:[#allocation3] sm:$0xc] %vm3177_vm5, %v3175_v61 }
 0x4d7   :  { %v6238_v4 = vld [vmem:[#allocation3] sm:$0xf] }
 0x4d8   :  { %4525 = vmatmul.mubr.msk.bf16.vlgmr.msra.gmra.mrb[36].mxu0 %vm2837_vm1, %v6238_v4  ;;  %4527 = vmatmul.mubr.msk.bf16.vlgmr.msra.gmra.mrb[36].mxu1 %vm2837_vm1, %v6238_v4 }
 0x4d9   :  { %3459 = vmatpush1.bf16.msra.mxu0 %v3293_v2  ;;  %3500 = vmatpush1.bf16.msra.mxu1 %v3299_v3 }
 0x4da   :  { %3490 = vmatprep.mubr.bf16.mxu0 %v5329_v52  ;;  %3531 = vmatprep.mubr.bf16.mxu1 %v5329_v52 }
 0x4db   :  { %4532 = vmatprep.subr.msk.bf16.mxu0 %vm3279_vm3, %v4501_v5  ;;  %4534 = vmatprep.subr.msk.bf16.mxu1 %vm3279_vm3, %v4503_v6 }
 0x4e0   :  { %4529 = vmatmul.mubr.msk.bf16.vlgmr.msra.gmra.mrb[40].mxu0 %vm2837_vm1, %v6238_v4  ;;  %4531 = vmatmul.mubr.msk.bf16.vlgmr.msra.gmra.mrb[40].mxu1 %vm2837_vm1, %v6238_v4 }
 0x4e1   :  { %3541 = vmatpush1.bf16.msra.mxu0 %v3305_v11  ;;  %3582 = vmatpush1.bf16.msra.mxu1 %v3311_v12 }
 0x4e2   :  { %3572 = vmatprep.mubr.bf16.mxu0 %v5329_v52  ;;  %3613 = vmatprep.mubr.bf16.mxu1 %v5329_v52 }
 0x4e3   :  { %4536 = vmatprep.subr.msk.bf16.mxu0 %vm3279_vm3, %v4505_v13  ;;  %4538 = vmatprep.subr.msk.bf16.mxu1 %vm3279_vm3, %v4507_v14 }
 0x4e8   :  { %4533 = vmatmul.mubr.msk.bf16.vlgmr.msra.gmra.mrb[44].mxu0 %vm2837_vm1, %v6238_v4  ;;  %4535 = vmatmul.mubr.msk.bf16.vlgmr.msra.gmra.mrb[44].mxu1 %vm2837_vm1, %v6238_v4 }
 0x4e9   :  { %3623 = vmatpush1.bf16.msra.mxu0 %v3317_v19  ;;  %3664 = vmatpush1.bf16.msra.mxu1 %v3323_v20 }
 0x4ea   :  { %3654 = vmatprep.mubr.bf16.mxu0 %v5329_v52  ;;  %3695 = vmatprep.mubr.bf16.mxu1 %v5329_v52 }
 0x4eb   :  { %4540 = vmatprep.subr.msk.bf16.mxu0 %vm3279_vm3, %v4509_v21  ;;  %4542 = vmatprep.subr.msk.bf16.mxu1 %vm3279_vm3, %v4511_v22 }
 0x4f0   :  { %4537 = vmatmul.mubr.msk.bf16.vlgmr.msra.gmra.mrb[48].mxu0 %vm2837_vm1, %v6238_v4  ;;  %4539 = vmatmul.mubr.msk.bf16.vlgmr.msra.gmra.mrb[48].mxu1 %vm2837_vm1, %v6238_v4 }
 0x4f1   :  { %3705 = vmatpush1.bf16.msra.mxu0 %v3329_v27  ;;  %3746 = vmatpush1.bf16.msra.mxu1 %v3335_v28 }
 0x4f2   :  { %3736 = vmatprep.mubr.bf16.mxu0 %v5329_v52  ;;  %3777 = vmatprep.mubr.bf16.mxu1 %v5329_v52 }
 0x4f3   :  { %4544 = vmatprep.subr.msk.bf16.mxu0 %vm3279_vm3, %v4513_v29  ;;  %4546 = vmatprep.subr.msk.bf16.mxu1 %vm3279_vm3, %v4515_v30 }
 0x4f8   :  { %4541 = vmatmul.mubr.msk.bf16.vlgmr.msra.gmra.mrb[52].mxu0 %vm2837_vm1, %v6238_v4  ;;  %4543 = vmatmul.mubr.msk.bf16.vlgmr.msra.gmra.mrb[52].mxu1 %vm2837_vm1, %v6238_v4 }
 0x4f9   :  { %3787 = vmatpush1.bf16.msra.mxu0 %v3341_v36  ;;  %3828 = vmatpush1.bf16.msra.mxu1 %v3347_v37 }
 0x4fa   :  { %3818 = vmatprep.mubr.bf16.mxu0 %v5329_v52  ;;  %3859 = vmatprep.mubr.bf16.mxu1 %v5329_v52 }
 0x4fb   :  { %4548 = vmatprep.subr.msk.bf16.mxu0 %vm3279_vm3, %v4517_v38  ;;  %4550 = vmatprep.subr.msk.bf16.mxu1 %vm3279_vm3, %v4519_v39 }
 0x500   :  { %4545 = vmatmul.mubr.msk.bf16.vlgmr.msra.gmra.mrb[56].mxu0 %vm2837_vm1, %v6238_v4  ;;  %4547 = vmatmul.mubr.msk.bf16.vlgmr.msra.gmra.mrb[56].mxu1 %vm2837_vm1, %v6238_v4 }
 0x501   :  { %3869 = vmatpush1.bf16.msra.mxu0 %v3353_v44  ;;  %3910 = vmatpush1.bf16.msra.mxu1 %v3359_v45 }
 0x502   :  { %3900 = vmatprep.mubr.bf16.mxu0 %v5329_v52  ;;  %3941 = vmatprep.mubr.bf16.mxu1 %v5329_v52 }
 0x503   :  { %4552 = vmatprep.subr.msk.bf16.mxu0 %vm3279_vm3, %v4521_v46  ;;  %4554 = vmatprep.subr.msk.bf16.mxu1 %vm3279_vm3, %v4523_v47 }
 0x508   :  { %4549 = vmatmul.mubr.msk.bf16.vlgmr.msra.gmra.mrb[60].mxu0 %vm2837_vm1, %v6238_v4  ;;  %4551 = vmatmul.mubr.msk.bf16.vlgmr.msra.gmra.mrb[60].mxu1 %vm2837_vm1, %v6238_v4 }
 0x509   :  { %3951 = vmatpush1.bf16.msra.mxu0 %v3365_v49  ;;  %3992 = vmatpush1.bf16.msra.mxu1 %v3371_v50 }
 0x50a   :  { %3982 = vmatprep.mubr.bf16.mxu0 %v5329_v52  ;;  %4023 = vmatprep.mubr.bf16.mxu1 %v5329_v52 }
 0x510   :  { %4553 = vmatmul.mubr.msk.bf16.vlgmr.msra.gmra.mrb[64].mxu0 %vm2837_vm1, %v6238_v4  ;;  %4555 = vmatmul.mubr.msk.bf16.vlgmr.msra.gmra.mrb[64].mxu1 %vm2837_vm1, %v6238_v4 }
 0x511   :  { %5314 = shalt.err (!%p5311_p4)
}
 0x512   :  { %s5315_s21 = scalar_lea.hbm %s6404_s4, 128 }
 0x513   :  { %p5316_p5 = scmp.ne.s32.totalorder %s6404_s4, %s5315_s21  ;;  %p5319_p6 = scmp.lt.u32.totalorder %s5315_s21, %s6404_s4 }
 0x515   :  { %p5321_p7 = pnand %p5319_p6, %p5316_p5 }
 0x517   :  { %5324 = shalt.err (!%p5321_p7)
}
 0x518   :  { %s5331_s26 = smov 64   ;;  %s5332_s27 = smov 4  }
 0x519   :  { %4187 = dma.vmem_to_hbm [thread:$0]  %s4182_s17, 128, %s6404_s4, [#allocation5], %s5331_s26, %s5331_s26, %s5332_s27  }
 0x5ab   :  { %v3410_v51 = vpop.f32.mrb[36].mxu0  ;;  %v3451_v52 = vpop.f32.mrb[36].mxu1 }
 0x5ac   :  { %v3412_v53 = vpop.f32.mrb[37].mxu0  ;;  %v3453_v54 = vpop.f32.mrb[37].mxu1 }
 0x5ad   :  { %v4573_v55 = vpack.c.bf16 %v3412_v53, %v3410_v51  ;;  %v4574_v56 = vpack.c.bf16 %v3453_v54, %v3451_v52  ;;  %v3414_v57 = vpop.f32.mrb[38].mxu0  ;;  %v3455_v58 = vpop.f32.mrb[38].mxu1 }
 0x5ae   :  { %v3415_v59 = vpop.f32.mrb[39].mxu0  ;;  %v3456_v60 = vpop.f32.mrb[39].mxu1 }
 0x5af   :  { %4160 = vst [vmem:[%s6405_s5] sm:$0xff] %v4573_v55  ;;  %4161 = vst [vmem:[%s6405_s5 + $0x8] sm:$0xff] %v4574_v56 }
 0x5b3   :  { %v3492_v61 = vpop.f32.mrb[40].mxu0  ;;  %v3533_v62 = vpop.f32.mrb[40].mxu1 }
 0x5b4   :  { %v3494_v63 = vpop.f32.mrb[41].mxu0  ;;  %v3535_v0 = vpop.f32.mrb[41].mxu1 }
 0x5b5   :  { %v4575_v1 = vpack.c.bf16 %v3494_v63, %v3492_v61  ;;  %v4576_v2 = vpack.c.bf16 %v3535_v0, %v3533_v62  ;;  %v3496_v3 = vpop.f32.mrb[42].mxu0  ;;  %v3537_v4 = vpop.f32.mrb[42].mxu1 }
 0x5b6   :  { %v3497_v5 = vpop.f32.mrb[43].mxu0  ;;  %v3538_v6 = vpop.f32.mrb[43].mxu1 }
 0x5b7   :  { %4162 = vst [vmem:[%s6405_s5 + $0x10] sm:$0xff] %v4575_v1  ;;  %4163 = vst [vmem:[%s6405_s5 + $0x18] sm:$0xff] %v4576_v2 }
 0x5bb   :  { %v3574_v7 = vpop.f32.mrb[44].mxu0  ;;  %v3615_v8 = vpop.f32.mrb[44].mxu1 }
 0x5bc   :  { %v3576_v9 = vpop.f32.mrb[45].mxu0  ;;  %v3617_v10 = vpop.f32.mrb[45].mxu1 }
 0x5bd   :  { %v4577_v11 = vpack.c.bf16 %v3576_v9, %v3574_v7  ;;  %v4578_v12 = vpack.c.bf16 %v3617_v10, %v3615_v8  ;;  %v3578_v13 = vpop.f32.mrb[46].mxu0  ;;  %v3619_v14 = vpop.f32.mrb[46].mxu1 }
 0x5be   :  { %v3579_v15 = vpop.f32.mrb[47].mxu0  ;;  %v3620_v16 = vpop.f32.mrb[47].mxu1 }
 0x5bf   :  { %4164 = vst [vmem:[%s6405_s5 + $0x20] sm:$0xff] %v4577_v11  ;;  %4165 = vst [vmem:[%s6405_s5 + $0x28] sm:$0xff] %v4578_v12 }
 0x5c3   :  { %v3656_v17 = vpop.f32.mrb[48].mxu0  ;;  %v3697_v18 = vpop.f32.mrb[48].mxu1 }
 0x5c4   :  { %v3658_v19 = vpop.f32.mrb[49].mxu0  ;;  %v3699_v20 = vpop.f32.mrb[49].mxu1 }
 0x5c5   :  { %v4579_v21 = vpack.c.bf16 %v3658_v19, %v3656_v17  ;;  %v4580_v22 = vpack.c.bf16 %v3699_v20, %v3697_v18  ;;  %v3660_v23 = vpop.f32.mrb[50].mxu0  ;;  %v3701_v24 = vpop.f32.mrb[50].mxu1 }
 0x5c6   :  { %v3661_v25 = vpop.f32.mrb[51].mxu0  ;;  %v3702_v26 = vpop.f32.mrb[51].mxu1 }
 0x5c7   :  { %4166 = vst [vmem:[%s6405_s5 + $0x30] sm:$0xff] %v4579_v21  ;;  %4167 = vst [vmem:[%s6405_s5 + $0x38] sm:$0xff] %v4580_v22 }
 0x5cb   :  { %v3738_v27 = vpop.f32.mrb[52].mxu0  ;;  %v3779_v28 = vpop.f32.mrb[52].mxu1 }
 0x5cc   :  { %v3740_v29 = vpop.f32.mrb[53].mxu0  ;;  %v3781_v30 = vpop.f32.mrb[53].mxu1 }
 0x5cd   :  { %v4581_v31 = vpack.c.bf16 %v3740_v29, %v3738_v27  ;;  %v4582_v33 = vpack.c.bf16 %v3781_v30, %v3779_v28  ;;  %v3742_v34 = vpop.f32.mrb[54].mxu0  ;;  %v3783_v35 = vpop.f32.mrb[54].mxu1 }
 0x5ce   :  { %v3743_v36 = vpop.f32.mrb[55].mxu0  ;;  %v3784_v37 = vpop.f32.mrb[55].mxu1 }
 0x5cf   :  { %4168 = vst [vmem:[%s6405_s5 + $0x40] sm:$0xff] %v4581_v31  ;;  %4169 = vst [vmem:[%s6405_s5 + $0x48] sm:$0xff] %v4582_v33 }
 0x5d3   :  { %v3820_v38 = vpop.f32.mrb[56].mxu0  ;;  %v3861_v39 = vpop.f32.mrb[56].mxu1 }
 0x5d4   :  { %v3822_v40 = vpop.f32.mrb[57].mxu0  ;;  %v3863_v41 = vpop.f32.mrb[57].mxu1 }
 0x5d5   :  { %v4583_v42 = vpack.c.bf16 %v3822_v40, %v3820_v38  ;;  %v4584_v43 = vpack.c.bf16 %v3863_v41, %v3861_v39  ;;  %v3824_v44 = vpop.f32.mrb[58].mxu0  ;;  %v3865_v45 = vpop.f32.mrb[58].mxu1 }
 0x5d6   :  { %v3825_v46 = vpop.f32.mrb[59].mxu0  ;;  %v3866_v47 = vpop.f32.mrb[59].mxu1 }
 0x5d7   :  { %4170 = vst [vmem:[%s6405_s5 + $0x50] sm:$0xff] %v4583_v42  ;;  %4171 = vst [vmem:[%s6405_s5 + $0x58] sm:$0xff] %v4584_v43 }
 0x5db   :  { %v3902_v48 = vpop.f32.mrb[60].mxu0  ;;  %v3943_v32 = vpop.f32.mrb[60].mxu1 }
 0x5dc   :  { %v3904_v49 = vpop.f32.mrb[61].mxu0  ;;  %v3945_v50 = vpop.f32.mrb[61].mxu1 }
 0x5dd   :  { %v4585_v51 = vpack.c.bf16 %v3904_v49, %v3902_v48  ;;  %v4586_v52 = vpack.c.bf16 %v3945_v50, %v3943_v32  ;;  %v3906_v53 = vpop.f32.mrb[62].mxu0  ;;  %v3947_v54 = vpop.f32.mrb[62].mxu1 }
 0x5de   :  { %v3907_v55 = vpop.f32.mrb[63].mxu0  ;;  %v3948_v56 = vpop.f32.mrb[63].mxu1 }
 0x5df   :  { %4172 = vst [vmem:[%s6405_s5 + $0x60] sm:$0xff] %v4585_v51  ;;  %4173 = vst [vmem:[%s6405_s5 + $0x68] sm:$0xff] %v4586_v52 }
 0x5e3   :  { %v3984_v57 = vpop.f32.mrb[64].mxu0  ;;  %v4025_v58 = vpop.f32.mrb[64].mxu1 }
 0x5e4   :  { %v3986_v59 = vpop.f32.mrb[65].mxu0  ;;  %v4027_v60 = vpop.f32.mrb[65].mxu1 }
 0x5e5   :  { %v4587_v61 = vpack.c.bf16 %v3986_v59, %v3984_v57  ;;  %v4588_v62 = vpack.c.bf16 %v4027_v60, %v4025_v58  ;;  %v3988_v63 = vpop.f32.mrb[66].mxu0  ;;  %v4029_v0 = vpop.f32.mrb[66].mxu1 }
 0x5e6   :  { %v3989_v1 = vpop.f32.mrb[67].mxu0  ;;  %v4030_v2 = vpop.f32.mrb[67].mxu1 }
 0x5e7   :  { %4174 = vst [vmem:[%s6405_s5 + $0x70] sm:$0xff] %v4587_v61  ;;  %4175 = vst [vmem:[%s6405_s5 + $0x78] sm:$0xff] %v4588_v62 }
 0x5e8   :  { %5325 = dma.done.wait [#allocation5], 128  }
 0x5e9   :  { %5326 = vsyncadd [#allocation5], 4294967168 }
 0x5ea   :  { %4195 = vsyncpa [#allocation5], 1 }

</bundles_post_ra>
